<compile_context>
chip_gen: v7x
topology: tpu7x:2x2x1
jax: 0.10.0
libtpu: 0.0.40
codegen_flags: <defaults>
</compile_context>

<pallas_src>
import jax
import jax.numpy as jnp
from jax.experimental import pallas as pl
from jax.experimental.pallas import tpu as pltpu

# Small, module-consistent shapes.
B, S = 2, 8            # batch, sequence length
VOCAB = 50             # token vocabulary size (embedding_model)
EMB = 32               # embedding_model hidden size
HID = 32               # args.lstm_hidden_unit_dims (per direction)
NUM_LABELS = 9         # vocab.get_vocab_size('entity_labels')
LPAD = 128             # label dim padded to a full lane width


# ----------------------------------------------------------------------------
# Fused kernel: BiLSTM (single layer, bidirectional, mask-gated recurrence ==
# pack_padded_sequence) -> linear -> log_softmax -> masked-mean NLL + argmax.
# ----------------------------------------------------------------------------
def _joint_ent_kernel(x_ref, mcat_ref, labels_ref,
                      wih_ref, bih_ref, whh_ref,
                      p_ref, wdecf_ref, wdecb_ref, bdec_ref,
                      loss_ref, preds_ref,
                      enc_scr):
    H = HID

    # Hoisted input projection: one [S*B, 2E] @ [2E, 8H] matmul covers both
    # directions (backward half already time-reversed by the wrapper) and all
    # four gates. bf16 operands, f32 accumulation.
    gx = jnp.dot(x_ref[...], wih_ref[...],
                 preferred_element_type=jnp.float32) + bih_ref[...]     # [S*B, 8H]

    mcat = mcat_ref[...]            # [S*B, 2H]  fwd mask | time-reversed bwd mask
    whh = whh_ref[...]              # [2H, 8H]   bf16 block-diag recurrent weights

    h_cat = jnp.zeros((B, 2 * H), jnp.float32)    # [h_f | h_b]
    c_cat = jnp.zeros((B, 2 * H), jnp.float32)

    # Fully-unrolled time loop; one recurrent matmul per step (fwd+bwd fused).
    # Gate column layout (H-wide blocks): [i_f, i_b, f_f, f_b, g_f, g_b, o_f, o_b]
    for step in range(S):
        gx_t = gx[step * B:(step + 1) * B, :]       # [B, 8H]
        m_t = mcat[step * B:(step + 1) * B, :]      # [B, 2H]

        gates = gx_t + jnp.dot(h_cat.astype(jnp.bfloat16), whh,
                               preferred_element_type=jnp.float32)      # [B, 8H]
        sig = jax.nn.sigmoid(gates)                 # one full-width EUP pass
        i_cat = sig[:, 0 * H:2 * H]
        f_cat = sig[:, 2 * H:4 * H]
        g_cat = jnp.tanh(gates[:, 4 * H:6 * H])
        o_cat = sig[:, 6 * H:8 * H]

        c_new = f_cat * c_cat + i_cat * g_cat
        h_new = o_cat * jnp.tanh(c_new)
        h_cat = h_cat + m_t * (h_new - h_cat)       # mask-gated carry
        c_cat = c_cat + m_t * (c_new - c_cat)

        # One wide [B, 2H] store per step (step order; fwd half == time `step`,
        # bwd half == time S-1-step). Off the recurrence dependency chain.
        enc_scr[step * B:(step + 1) * B, :] = m_t * h_new

    # ---- SeqSoftmaxDecoder ----
    enc = enc_scr[...].astype(jnp.bfloat16)                             # [S*B, 2H]
    enc_f = enc[:, 0:H]                                                 # time order
    # Un-reverse the backward half's time order with a permutation matmul.
    enc_b = jnp.dot(p_ref[...], enc[:, H:2 * H],
                    preferred_element_type=jnp.float32).astype(jnp.bfloat16)

    logits = (jnp.dot(enc_f, wdecf_ref[...], preferred_element_type=jnp.float32)
              + jnp.dot(enc_b, wdecb_ref[...], preferred_element_type=jnp.float32)
              + bdec_ref[...])                                          # [S*B, 128]
    n, lpad = logits.shape

    mx = jnp.max(logits, axis=-1, keepdims=True)
    z = logits - mx
    lse = jnp.log(jnp.sum(jnp.exp(z), axis=-1, keepdims=True))
    logp = z - lse                                                      # [N, 128]

    lane = jax.lax.broadcasted_iota(jnp.int32, (n, lpad), 1)
    onehot = (lane == labels_ref[...]).astype(jnp.float32)              # labels [N, 1]
    nll = -jnp.sum(logp * onehot, axis=-1, keepdims=True)               # [N, 1]

    mask_col = mcat[:, 0:1]                     # token mask, forward time order
    num = jnp.sum(nll * mask_col, axis=(0, 1), keepdims=True)           # (1, 1)
    den = jnp.maximum(jnp.sum(mask_col, axis=(0, 1), keepdims=True), 1.0)
    loss_ref[...] = num / den

    # First-max index (torch.argmax tie behaviour); padded label lanes carry a
    # -1e30 bias so they are never selected.
    preds = jnp.min(jnp.where(logits >= mx, lane, lpad), axis=-1, keepdims=True)
    preds_ref[...] = preds.astype(jnp.int32)


# ----------------------------------------------------------------------------
# Parameter packing helpers + wrapper ≈ JointEntModel.forward
# ----------------------------------------------------------------------------
def _interleave_gate_cols(wf, wb, h):
    """[R, 4h] fwd & [R, 4h] bwd weights (gate order i,f,g,o) -> [R, 8h] with
    columns ordered [i_f, i_b, f_f, f_b, g_f, g_b, o_f, o_b]."""
    cols = []
    for g in range(4):
        cols.append(wf[:, g * h:(g + 1) * h])
        cols.append(wb[:, g * h:(g + 1) * h])
    return jnp.concatenate(cols, axis=1)


def init_params(key):
    keys = jax.random.split(key, 8)
    s = 0.1
    return {
        'embedding': jax.random.normal(keys[0], (VOCAB, EMB), jnp.float32) * s,
        'wih_f': jax.random.normal(keys[1], (EMB, 4 * HID), jnp.float32) * s,
        'whh_f': jax.random.normal(keys[2], (HID, 4 * HID), jnp.float32) * s,
        'b_f': jnp.zeros((1, 4 * HID), jnp.float32),
        'wih_b': jax.random.normal(keys[3], (EMB, 4 * HID), jnp.float32) * s,
        'whh_b': jax.random.normal(keys[4], (HID, 4 * HID), jnp.float32) * s,
        'b_b': jnp.zeros((1, 4 * HID), jnp.float32),
        'w_dec': jax.random.normal(keys[5], (2 * HID, NUM_LABELS), jnp.float32) * s,
        'b_dec': jnp.zeros((1, NUM_LABELS), jnp.float32),
    }


@jax.jit
def joint_ent_model_forward(params, tokens, tokens_lens, entity_labels):
    H, E = HID, EMB
    # embedding_model (glue: simple word-embedding lookup)
    x = jnp.take(params['embedding'], tokens, axis=0)                   # [B, S, E]
    b, s, _ = x.shape
    mask = (jnp.arange(s)[None, :] < tokens_lens[:, None]).astype(jnp.float32)  # [B, S]

    # Time-major flattening; backward direction gets time-reversed inputs so the
    # kernel's merged step uses one contiguous [B, 8H] row slice.
    x_sm = jnp.transpose(x, (1, 0, 2)).reshape(s * b, E)
    x_rev_sm = jnp.transpose(x[:, ::-1, :], (1, 0, 2)).reshape(s * b, E)
    x_merged = jnp.concatenate([x_sm, x_rev_sm], axis=1).astype(jnp.bfloat16)    # [S*B, 2E]

    m_sm = jnp.transpose(mask).reshape(s * b, 1)
    m_rev_sm = jnp.transpose(mask[:, ::-1]).reshape(s * b, 1)
    mcat = jnp.concatenate([jnp.broadcast_to(m_sm, (s * b, H)),
                            jnp.broadcast_to(m_rev_sm, (s * b, H))], axis=1)     # [S*B, 2H]
    labels_sm = jnp.transpose(entity_labels).reshape(s * b, 1).astype(jnp.int32)

    # Packed / padded parameters (all one-time wrapper work, weights as bf16).
    z_e = jnp.zeros((E, 4 * H), jnp.float32)
    wih_blk = _interleave_gate_cols(
        jnp.concatenate([params['wih_f'], z_e], axis=0),
        jnp.concatenate([z_e, params['wih_b']], axis=0), H).astype(jnp.bfloat16)  # [2E, 8H]
    z_h = jnp.zeros((H, 4 * H), jnp.float32)
    whh_blk = _interleave_gate_cols(
        jnp.concatenate([params['whh_f'], z_h], axis=0),
        jnp.concatenate([z_h, params['whh_b']], axis=0), H).astype(jnp.bfloat16)  # [2H, 8H]
    bih_cat = _interleave_gate_cols(params['b_f'], params['b_b'], H)              # [1, 8H] f32

    wdec_f = jnp.zeros((H, LPAD), jnp.float32).at[:, :NUM_LABELS].set(
        params['w_dec'][:H]).astype(jnp.bfloat16)                                 # [H, 128]
    wdec_b = jnp.zeros((H, LPAD), jnp.float32).at[:, :NUM_LABELS].set(
        params['w_dec'][H:]).astype(jnp.bfloat16)                                 # [H, 128]
    bdec_pad = jnp.full((1, LPAD), -1e30, jnp.float32).at[:, :NUM_LABELS].set(
        params['b_dec'])

    # Row-block reversal permutation: row i picks row (S-1 - i//B)*B + i%B.
    idx = jnp.arange(s * b)
    rev = (s - 1 - idx // b) * b + (idx % b)
    p_rev = (rev[:, None] == jnp.arange(s * b)[None, :]).astype(jnp.bfloat16)     # [S*B, S*B]

    vmem = pl.BlockSpec(memory_space=pltpu.MemorySpace.VMEM)
    loss, preds = pl.pallas_call(
        _joint_ent_kernel,
        out_shape=(jax.ShapeDtypeStruct((1, 1), jnp.float32),
                   jax.ShapeDtypeStruct((s * b, 1), jnp.int32)),
        in_specs=[vmem] * 10,
        out_specs=(vmem, vmem),
        scratch_shapes=[pltpu.VMEM((s * b, 2 * H), jnp.float32)],   # encoder slab
    )(x_merged, mcat, labels_sm, wih_blk, bih_cat, whh_blk,
      p_rev, wdec_f, wdec_b, bdec_pad)

    preds_bs = jnp.transpose(preds.reshape(s, b))                    # [B, S]

    # TODO(synk): get_ent_preds / get_entity_span (vocab index->string mapping
    # and Python span decoding) has no Pallas equivalent; kept host-side.
    return {
        'sequence_label_preds': preds_bs,
        'ent_loss': loss[0, 0],
    }


if __name__ == "__main__":
    key = jax.random.PRNGKey(0)
    pkey, tkey, lkey = jax.random.split(key, 3)
    params = init_params(pkey)
    tokens = jax.random.randint(tkey, (B, S), 0, VOCAB, dtype=jnp.int32)
    entity_labels = jax.random.randint(lkey, (B, S), 0, NUM_LABELS, dtype=jnp.int32)
    tokens_lens = jnp.array([S, S - 3], dtype=jnp.int32)

    results = joint_ent_model_forward(params, tokens, tokens_lens, entity_labels)
    jax.block_until_ready(results)
    print("KERNEL_OK")
</pallas_src>

<mosaic_0001>
module attributes {stable_mosaic.version = 11 : i64} {
  func.func @_joint_ent_kernel(%arg0: memref<16x64xbf16, #tpu.memory_space<vmem>>, %arg1: memref<16x64xf32, #tpu.memory_space<vmem>>, %arg2: memref<16x1xi32, #tpu.memory_space<vmem>>, %arg3: memref<64x256xbf16, #tpu.memory_space<vmem>>, %arg4: memref<1x256xf32, #tpu.memory_space<vmem>>, %arg5: memref<64x256xbf16, #tpu.memory_space<vmem>>, %arg6: memref<16x16xbf16, #tpu.memory_space<vmem>>, %arg7: memref<32x128xbf16, #tpu.memory_space<vmem>>, %arg8: memref<32x128xbf16, #tpu.memory_space<vmem>>, %arg9: memref<1x128xf32, #tpu.memory_space<vmem>>, %arg10: memref<1x1xf32, #tpu.memory_space<vmem>>, %arg11: memref<16x1xi32, #tpu.memory_space<vmem>>, %arg12: memref<16x64xf32, #tpu.memory_space<vmem>>) attributes {dimension_semantics = [], scalar_prefetch = 0 : i64, scratch_operands = 1 : i64, tpu.core_type = #tpu.core_type<tc>} {
    %c0 = arith.constant 0 : index
    %c0_0 = arith.constant 0 : index
    %0 = vector.load %arg0[%c0, %c0_0] : memref<16x64xbf16, #tpu.memory_space<vmem>>, vector<16x64xbf16>
    %c0_1 = arith.constant 0 : index
    %c0_2 = arith.constant 0 : index
    %1 = vector.load %arg3[%c0_1, %c0_2] : memref<64x256xbf16, #tpu.memory_space<vmem>>, vector<64x256xbf16>
    %cst = arith.constant dense<0.000000e+00> : vector<16x256xf32>
    %2 = tpu.matmul %0, %1, %cst {dimension_numbers = #tpu.dot_dimension_numbers<[1], [0], [0], [1], [0, 0, 1, 1], [], []>} : vector<16x64xbf16>, vector<64x256xbf16>, vector<16x256xf32> -> vector<16x256xf32>
    %c0_3 = arith.constant 0 : index
    %c0_4 = arith.constant 0 : index
    %3 = vector.load %arg4[%c0_3, %c0_4] : memref<1x256xf32, #tpu.memory_space<vmem>>, vector<1x256xf32>
    %4 = vector.broadcast %3 : vector<1x256xf32> to vector<16x256xf32>
    %5 = arith.addf %2, %4 : vector<16x256xf32>
    %c0_5 = arith.constant 0 : index
    %c0_6 = arith.constant 0 : index
    %6 = vector.load %arg1[%c0_5, %c0_6] : memref<16x64xf32, #tpu.memory_space<vmem>>, vector<16x64xf32>
    %c0_7 = arith.constant 0 : index
    %c0_8 = arith.constant 0 : index
    %7 = vector.load %arg5[%c0_7, %c0_8] : memref<64x256xbf16, #tpu.memory_space<vmem>>, vector<64x256xbf16>
    %cst_9 = arith.constant 0.000000e+00 : f32
    %8 = vector.broadcast %cst_9 : f32 to vector<2x64xf32>
    %cst_10 = arith.constant 0.000000e+00 : f32
    %9 = vector.broadcast %cst_10 : f32 to vector<2x64xf32>
    %10 = vector.extract_strided_slice %5 {offsets = [0, 0], sizes = [2, 256], strides = [1, 1]} : vector<16x256xf32> to vector<2x256xf32>
    %11 = vector.extract_strided_slice %6 {offsets = [0, 0], sizes = [2, 64], strides = [1, 1]} : vector<16x64xf32> to vector<2x64xf32>
    %12 = arith.truncf %8 : vector<2x64xf32> to vector<2x64xbf16>
    %cst_11 = arith.constant dense<0.000000e+00> : vector<2x256xf32>
    %13 = tpu.matmul %12, %7, %cst_11 {dimension_numbers = #tpu.dot_dimension_numbers<[1], [0], [0], [1], [0, 0, 1, 1], [], []>} : vector<2x64xbf16>, vector<64x256xbf16>, vector<2x256xf32> -> vector<2x256xf32>
    %14 = arith.addf %10, %13 : vector<2x256xf32>
    %15 = arith.negf %14 : vector<2x256xf32>
    %16 = math.exp %15 : vector<2x256xf32>
    %cst_12 = arith.constant 1.000000e+00 : f32
    %17 = vector.broadcast %cst_12 : f32 to vector<2x256xf32>
    %18 = arith.addf %17, %16 : vector<2x256xf32>
    %19 = arith.divf %17, %18 : vector<2x256xf32>
    %20 = vector.extract_strided_slice %19 {offsets = [0, 0], sizes = [2, 64], strides = [1, 1]} : vector<2x256xf32> to vector<2x64xf32>
    %21 = vector.extract_strided_slice %19 {offsets = [0, 64], sizes = [2, 64], strides = [1, 1]} : vector<2x256xf32> to vector<2x64xf32>
    %22 = vector.extract_strided_slice %14 {offsets = [0, 128], sizes = [2, 64], strides = [1, 1]} : vector<2x256xf32> to vector<2x64xf32>
    %23 = math.tanh %22 : vector<2x64xf32>
    %24 = vector.extract_strided_slice %19 {offsets = [0, 192], sizes = [2, 64], strides = [1, 1]} : vector<2x256xf32> to vector<2x64xf32>
    %25 = arith.mulf %21, %9 : vector<2x64xf32>
    %26 = arith.mulf %20, %23 : vector<2x64xf32>
    %27 = arith.addf %25, %26 : vector<2x64xf32>
    %28 = math.tanh %27 : vector<2x64xf32>
    %29 = arith.mulf %24, %28 : vector<2x64xf32>
    %30 = arith.subf %29, %8 : vector<2x64xf32>
    %31 = arith.mulf %11, %30 : vector<2x64xf32>
    %32 = arith.addf %8, %31 : vector<2x64xf32>
    %33 = arith.subf %27, %9 : vector<2x64xf32>
    %34 = arith.mulf %11, %33 : vector<2x64xf32>
    %35 = arith.addf %9, %34 : vector<2x64xf32>
    %36 = arith.mulf %11, %29 : vector<2x64xf32>
    %c0_13 = arith.constant 0 : index
    %c0_14 = arith.constant 0 : index
    %37 = vector.load %arg12[%c0_13, %c0_14] : memref<16x64xf32, #tpu.memory_space<vmem>>, vector<2x64xf32>
    tpu.vector_store %arg12[%c0_13, %c0_14], %36 {strides = array<i32>} : memref<16x64xf32, #tpu.memory_space<vmem>>, vector<2x64xf32>,
    %38 = vector.extract_strided_slice %5 {offsets = [2, 0], sizes = [2, 256], strides = [1, 1]} : vector<16x256xf32> to vector<2x256xf32>
    %39 = vector.extract_strided_slice %6 {offsets = [2, 0], sizes = [2, 64], strides = [1, 1]} : vector<16x64xf32> to vector<2x64xf32>
    %40 = arith.truncf %32 : vector<2x64xf32> to vector<2x64xbf16>
    %cst_15 = arith.constant dense<0.000000e+00> : vector<2x256xf32>
    %41 = tpu.matmul %40, %7, %cst_15 {dimension_numbers = #tpu.dot_dimension_numbers<[1], [0], [0], [1], [0, 0, 1, 1], [], []>} : vector<2x64xbf16>, vector<64x256xbf16>, vector<2x256xf32> -> vector<2x256xf32>
    %42 = arith.addf %38, %41 : vector<2x256xf32>
    %43 = arith.negf %42 : vector<2x256xf32>
    %44 = math.exp %43 : vector<2x256xf32>
    %cst_16 = arith.constant 1.000000e+00 : f32
    %45 = vector.broadcast %cst_16 : f32 to vector<2x256xf32>
    %46 = arith.addf %45, %44 : vector<2x256xf32>
    %47 = arith.divf %45, %46 : vector<2x256xf32>
    %48 = vector.extract_strided_slice %47 {offsets = [0, 0], sizes = [2, 64], strides = [1, 1]} : vector<2x256xf32> to vector<2x64xf32>
    %49 = vector.extract_strided_slice %47 {offsets = [0, 64], sizes = [2, 64], strides = [1, 1]} : vector<2x256xf32> to vector<2x64xf32>
    %50 = vector.extract_strided_slice %42 {offsets = [0, 128], sizes = [2, 64], strides = [1, 1]} : vector<2x256xf32> to vector<2x64xf32>
    %51 = math.tanh %50 : vector<2x64xf32>
    %52 = vector.extract_strided_slice %47 {offsets = [0, 192], sizes = [2, 64], strides = [1, 1]} : vector<2x256xf32> to vector<2x64xf32>
    %53 = arith.mulf %49, %35 : vector<2x64xf32>
    %54 = arith.mulf %48, %51 : vector<2x64xf32>
    %55 = arith.addf %53, %54 : vector<2x64xf32>
    %56 = math.tanh %55 : vector<2x64xf32>
    %57 = arith.mulf %52, %56 : vector<2x64xf32>
    %58 = arith.subf %57, %32 : vector<2x64xf32>
    %59 = arith.mulf %39, %58 : vector<2x64xf32>
    %60 = arith.addf %32, %59 : vector<2x64xf32>
    %61 = arith.subf %55, %35 : vector<2x64xf32>
    %62 = arith.mulf %39, %61 : vector<2x64xf32>
    %63 = arith.addf %35, %62 : vector<2x64xf32>
    %64 = arith.mulf %39, %57 : vector<2x64xf32>
    %c2 = arith.constant 2 : index
    %c0_17 = arith.constant 0 : index
    %65 = vector.load %arg12[%c2, %c0_17] : memref<16x64xf32, #tpu.memory_space<vmem>>, vector<2x64xf32>
    tpu.vector_store %arg12[%c2, %c0_17], %64 {strides = array<i32>} : memref<16x64xf32, #tpu.memory_space<vmem>>, vector<2x64xf32>,
    %66 = vector.extract_strided_slice %5 {offsets = [4, 0], sizes = [2, 256], strides = [1, 1]} : vector<16x256xf32> to vector<2x256xf32>
    %67 = vector.extract_strided_slice %6 {offsets = [4, 0], sizes = [2, 64], strides = [1, 1]} : vector<16x64xf32> to vector<2x64xf32>
    %68 = arith.truncf %60 : vector<2x64xf32> to vector<2x64xbf16>
    %cst_18 = arith.constant dense<0.000000e+00> : vector<2x256xf32>
    %69 = tpu.matmul %68, %7, %cst_18 {dimension_numbers = #tpu.dot_dimension_numbers<[1], [0], [0], [1], [0, 0, 1, 1], [], []>} : vector<2x64xbf16>, vector<64x256xbf16>, vector<2x256xf32> -> vector<2x256xf32>
    %70 = arith.addf %66, %69 : vector<2x256xf32>
    %71 = arith.negf %70 : vector<2x256xf32>
    %72 = math.exp %71 : vector<2x256xf32>
    %cst_19 = arith.constant 1.000000e+00 : f32
    %73 = vector.broadcast %cst_19 : f32 to vector<2x256xf32>
    %74 = arith.addf %73, %72 : vector<2x256xf32>
    %75 = arith.divf %73, %74 : vector<2x256xf32>
    %76 = vector.extract_strided_slice %75 {offsets = [0, 0], sizes = [2, 64], strides = [1, 1]} : vector<2x256xf32> to vector<2x64xf32>
    %77 = vector.extract_strided_slice %75 {offsets = [0, 64], sizes = [2, 64], strides = [1, 1]} : vector<2x256xf32> to vector<2x64xf32>
    %78 = vector.extract_strided_slice %70 {offsets = [0, 128], sizes = [2, 64], strides = [1, 1]} : vector<2x256xf32> to vector<2x64xf32>
    %79 = math.tanh %78 : vector<2x64xf32>
    %80 = vector.extract_strided_slice %75 {offsets = [0, 192], sizes = [2, 64], strides = [1, 1]} : vector<2x256xf32> to vector<2x64xf32>
    %81 = arith.mulf %77, %63 : vector<2x64xf32>
    %82 = arith.mulf %76, %79 : vector<2x64xf32>
    %83 = arith.addf %81, %82 : vector<2x64xf32>
    %84 = math.tanh %83 : vector<2x64xf32>
    %85 = arith.mulf %80, %84 : vector<2x64xf32>
    %86 = arith.subf %85, %60 : vector<2x64xf32>
    %87 = arith.mulf %67, %86 : vector<2x64xf32>
    %88 = arith.addf %60, %87 : vector<2x64xf32>
    %89 = arith.subf %83, %63 : vector<2x64xf32>
    %90 = arith.mulf %67, %89 : vector<2x64xf32>
    %91 = arith.addf %63, %90 : vector<2x64xf32>
    %92 = arith.mulf %67, %85 : vector<2x64xf32>
    %c4 = arith.constant 4 : index
    %c0_20 = arith.constant 0 : index
    %93 = vector.load %arg12[%c4, %c0_20] : memref<16x64xf32, #tpu.memory_space<vmem>>, vector<2x64xf32>
    tpu.vector_store %arg12[%c4, %c0_20], %92 {strides = array<i32>} : memref<16x64xf32, #tpu.memory_space<vmem>>, vector<2x64xf32>,
    %94 = vector.extract_strided_slice %5 {offsets = [6, 0], sizes = [2, 256], strides = [1, 1]} : vector<16x256xf32> to vector<2x256xf32>
    %95 = vector.extract_strided_slice %6 {offsets = [6, 0], sizes = [2, 64], strides = [1, 1]} : vector<16x64xf32> to vector<2x64xf32>
    %96 = arith.truncf %88 : vector<2x64xf32> to vector<2x64xbf16>
    %cst_21 = arith.constant dense<0.000000e+00> : vector<2x256xf32>
    %97 = tpu.matmul %96, %7, %cst_21 {dimension_numbers = #tpu.dot_dimension_numbers<[1], [0], [0], [1], [0, 0, 1, 1], [], []>} : vector<2x64xbf16>, vector<64x256xbf16>, vector<2x256xf32> -> vector<2x256xf32>
    %98 = arith.addf %94, %97 : vector<2x256xf32>
    %99 = arith.negf %98 : vector<2x256xf32>
    %100 = math.exp %99 : vector<2x256xf32>
    %cst_22 = arith.constant 1.000000e+00 : f32
    %101 = vector.broadcast %cst_22 : f32 to vector<2x256xf32>
    %102 = arith.addf %101, %100 : vector<2x256xf32>
    %103 = arith.divf %101, %102 : vector<2x256xf32>
    %104 = vector.extract_strided_slice %103 {offsets = [0, 0], sizes = [2, 64], strides = [1, 1]} : vector<2x256xf32> to vector<2x64xf32>
    %105 = vector.extract_strided_slice %103 {offsets = [0, 64], sizes = [2, 64], strides = [1, 1]} : vector<2x256xf32> to vector<2x64xf32>
    %106 = vector.extract_strided_slice %98 {offsets = [0, 128], sizes = [2, 64], strides = [1, 1]} : vector<2x256xf32> to vector<2x64xf32>
    %107 = math.tanh %106 : vector<2x64xf32>
    %108 = vector.extract_strided_slice %103 {offsets = [0, 192], sizes = [2, 64], strides = [1, 1]} : vector<2x256xf32> to vector<2x64xf32>
    %109 = arith.mulf %105, %91 : vector<2x64xf32>
    %110 = arith.mulf %104, %107 : vector<2x64xf32>
    %111 = arith.addf %109, %110 : vector<2x64xf32>
    %112 = math.tanh %111 : vector<2x64xf32>
    %113 = arith.mulf %108, %112 : vector<2x64xf32>
    %114 = arith.subf %113, %88 : vector<2x64xf32>
    %115 = arith.mulf %95, %114 : vector<2x64xf32>
    %116 = arith.addf %88, %115 : vector<2x64xf32>
    %117 = arith.subf %111, %91 : vector<2x64xf32>
    %118 = arith.mulf %95, %117 : vector<2x64xf32>
    %119 = arith.addf %91, %118 : vector<2x64xf32>
    %120 = arith.mulf %95, %113 : vector<2x64xf32>
    %c6 = arith.constant 6 : index
    %c0_23 = arith.constant 0 : index
    %121 = vector.load %arg12[%c6, %c0_23] : memref<16x64xf32, #tpu.memory_space<vmem>>, vector<2x64xf32>
    tpu.vector_store %arg12[%c6, %c0_23], %120 {strides = array<i32>} : memref<16x64xf32, #tpu.memory_space<vmem>>, vector<2x64xf32>,
    %122 = vector.extract_strided_slice %5 {offsets = [8, 0], sizes = [2, 256], strides = [1, 1]} : vector<16x256xf32> to vector<2x256xf32>
    %123 = vector.extract_strided_slice %6 {offsets = [8, 0], sizes = [2, 64], strides = [1, 1]} : vector<16x64xf32> to vector<2x64xf32>
    %124 = arith.truncf %116 : vector<2x64xf32> to vector<2x64xbf16>
    %cst_24 = arith.constant dense<0.000000e+00> : vector<2x256xf32>
    %125 = tpu.matmul %124, %7, %cst_24 {dimension_numbers = #tpu.dot_dimension_numbers<[1], [0], [0], [1], [0, 0, 1, 1], [], []>} : vector<2x64xbf16>, vector<64x256xbf16>, vector<2x256xf32> -> vector<2x256xf32>
    %126 = arith.addf %122, %125 : vector<2x256xf32>
    %127 = arith.negf %126 : vector<2x256xf32>
    %128 = math.exp %127 : vector<2x256xf32>
    %cst_25 = arith.constant 1.000000e+00 : f32
    %129 = vector.broadcast %cst_25 : f32 to vector<2x256xf32>
    %130 = arith.addf %129, %128 : vector<2x256xf32>
    %131 = arith.divf %129, %130 : vector<2x256xf32>
    %132 = vector.extract_strided_slice %131 {offsets = [0, 0], sizes = [2, 64], strides = [1, 1]} : vector<2x256xf32> to vector<2x64xf32>
    %133 = vector.extract_strided_slice %131 {offsets = [0, 64], sizes = [2, 64], strides = [1, 1]} : vector<2x256xf32> to vector<2x64xf32>
    %134 = vector.extract_strided_slice %126 {offsets = [0, 128], sizes = [2, 64], strides = [1, 1]} : vector<2x256xf32> to vector<2x64xf32>
    %135 = math.tanh %134 : vector<2x64xf32>
    %136 = vector.extract_strided_slice %131 {offsets = [0, 192], sizes = [2, 64], strides = [1, 1]} : vector<2x256xf32> to vector<2x64xf32>
    %137 = arith.mulf %133, %119 : vector<2x64xf32>
    %138 = arith.mulf %132, %135 : vector<2x64xf32>
    %139 = arith.addf %137, %138 : vector<2x64xf32>
    %140 = math.tanh %139 : vector<2x64xf32>
    %141 = arith.mulf %136, %140 : vector<2x64xf32>
    %142 = arith.subf %141, %116 : vector<2x64xf32>
    %143 = arith.mulf %123, %142 : vector<2x64xf32>
    %144 = arith.addf %116, %143 : vector<2x64xf32>
    %145 = arith.subf %139, %119 : vector<2x64xf32>
    %146 = arith.mulf %123, %145 : vector<2x64xf32>
    %147 = arith.addf %119, %146 : vector<2x64xf32>
    %148 = arith.mulf %123, %141 : vector<2x64xf32>
    %c8 = arith.constant 8 : index
    %c0_26 = arith.constant 0 : index
    %149 = vector.load %arg12[%c8, %c0_26] : memref<16x64xf32, #tpu.memory_space<vmem>>, vector<2x64xf32>
    tpu.vector_store %arg12[%c8, %c0_26], %148 {strides = array<i32>} : memref<16x64xf32, #tpu.memory_space<vmem>>, vector<2x64xf32>,
    %150 = vector.extract_strided_slice %5 {offsets = [10, 0], sizes = [2, 256], strides = [1, 1]} : vector<16x256xf32> to vector<2x256xf32>
    %151 = vector.extract_strided_slice %6 {offsets = [10, 0], sizes = [2, 64], strides = [1, 1]} : vector<16x64xf32> to vector<2x64xf32>
    %152 = arith.truncf %144 : vector<2x64xf32> to vector<2x64xbf16>
    %cst_27 = arith.constant dense<0.000000e+00> : vector<2x256xf32>
    %153 = tpu.matmul %152, %7, %cst_27 {dimension_numbers = #tpu.dot_dimension_numbers<[1], [0], [0], [1], [0, 0, 1, 1], [], []>} : vector<2x64xbf16>, vector<64x256xbf16>, vector<2x256xf32> -> vector<2x256xf32>
    %154 = arith.addf %150, %153 : vector<2x256xf32>
    %155 = arith.negf %154 : vector<2x256xf32>
    %156 = math.exp %155 : vector<2x256xf32>
    %cst_28 = arith.constant 1.000000e+00 : f32
    %157 = vector.broadcast %cst_28 : f32 to vector<2x256xf32>
    %158 = arith.addf %157, %156 : vector<2x256xf32>
    %159 = arith.divf %157, %158 : vector<2x256xf32>
    %160 = vector.extract_strided_slice %159 {offsets = [0, 0], sizes = [2, 64], strides = [1, 1]} : vector<2x256xf32> to vector<2x64xf32>
    %161 = vector.extract_strided_slice %159 {offsets = [0, 64], sizes = [2, 64], strides = [1, 1]} : vector<2x256xf32> to vector<2x64xf32>
    %162 = vector.extract_strided_slice %154 {offsets = [0, 128], sizes = [2, 64], strides = [1, 1]} : vector<2x256xf32> to vector<2x64xf32>
    %163 = math.tanh %162 : vector<2x64xf32>
    %164 = vector.extract_strided_slice %159 {offsets = [0, 192], sizes = [2, 64], strides = [1, 1]} : vector<2x256xf32> to vector<2x64xf32>
    %165 = arith.mulf %161, %147 : vector<2x64xf32>
    %166 = arith.mulf %160, %163 : vector<2x64xf32>
    %167 = arith.addf %165, %166 : vector<2x64xf32>
    %168 = math.tanh %167 : vector<2x64xf32>
    %169 = arith.mulf %164, %168 : vector<2x64xf32>
    %170 = arith.subf %169, %144 : vector<2x64xf32>
    %171 = arith.mulf %151, %170 : vector<2x64xf32>
    %172 = arith.addf %144, %171 : vector<2x64xf32>
    %173 = arith.subf %167, %147 : vector<2x64xf32>
    %174 = arith.mulf %151, %173 : vector<2x64xf32>
    %175 = arith.addf %147, %174 : vector<2x64xf32>
    %176 = arith.mulf %151, %169 : vector<2x64xf32>
    %c10 = arith.constant 10 : index
    %c0_29 = arith.constant 0 : index
    %177 = vector.load %arg12[%c10, %c0_29] : memref<16x64xf32, #tpu.memory_space<vmem>>, vector<2x64xf32>
    tpu.vector_store %arg12[%c10, %c0_29], %176 {strides = array<i32>} : memref<16x64xf32, #tpu.memory_space<vmem>>, vector<2x64xf32>,
    %178 = vector.extract_strided_slice %5 {offsets = [12, 0], sizes = [2, 256], strides = [1, 1]} : vector<16x256xf32> to vector<2x256xf32>
    %179 = vector.extract_strided_slice %6 {offsets = [12, 0], sizes = [2, 64], strides = [1, 1]} : vector<16x64xf32> to vector<2x64xf32>
    %180 = arith.truncf %172 : vector<2x64xf32> to vector<2x64xbf16>
    %cst_30 = arith.constant dense<0.000000e+00> : vector<2x256xf32>
    %181 = tpu.matmul %180, %7, %cst_30 {dimension_numbers = #tpu.dot_dimension_numbers<[1], [0], [0], [1], [0, 0, 1, 1], [], []>} : vector<2x64xbf16>, vector<64x256xbf16>, vector<2x256xf32> -> vector<2x256xf32>
    %182 = arith.addf %178, %181 : vector<2x256xf32>
    %183 = arith.negf %182 : vector<2x256xf32>
    %184 = math.exp %183 : vector<2x256xf32>
    %cst_31 = arith.constant 1.000000e+00 : f32
    %185 = vector.broadcast %cst_31 : f32 to vector<2x256xf32>
    %186 = arith.addf %185, %184 : vector<2x256xf32>
    %187 = arith.divf %185, %186 : vector<2x256xf32>
    %188 = vector.extract_strided_slice %187 {offsets = [0, 0], sizes = [2, 64], strides = [1, 1]} : vector<2x256xf32> to vector<2x64xf32>
    %189 = vector.extract_strided_slice %187 {offsets = [0, 64], sizes = [2, 64], strides = [1, 1]} : vector<2x256xf32> to vector<2x64xf32>
    %190 = vector.extract_strided_slice %182 {offsets = [0, 128], sizes = [2, 64], strides = [1, 1]} : vector<2x256xf32> to vector<2x64xf32>
    %191 = math.tanh %190 : vector<2x64xf32>
    %192 = vector.extract_strided_slice %187 {offsets = [0, 192], sizes = [2, 64], strides = [1, 1]} : vector<2x256xf32> to vector<2x64xf32>
    %193 = arith.mulf %189, %175 : vector<2x64xf32>
    %194 = arith.mulf %188, %191 : vector<2x64xf32>
    %195 = arith.addf %193, %194 : vector<2x64xf32>
    %196 = math.tanh %195 : vector<2x64xf32>
    %197 = arith.mulf %192, %196 : vector<2x64xf32>
    %198 = arith.subf %197, %172 : vector<2x64xf32>
    %199 = arith.mulf %179, %198 : vector<2x64xf32>
    %200 = arith.addf %172, %199 : vector<2x64xf32>
    %201 = arith.subf %195, %175 : vector<2x64xf32>
    %202 = arith.mulf %179, %201 : vector<2x64xf32>
    %203 = arith.addf %175, %202 : vector<2x64xf32>
    %204 = arith.mulf %179, %197 : vector<2x64xf32>
    %c12 = arith.constant 12 : index
    %c0_32 = arith.constant 0 : index
    %205 = vector.load %arg12[%c12, %c0_32] : memref<16x64xf32, #tpu.memory_space<vmem>>, vector<2x64xf32>
    tpu.vector_store %arg12[%c12, %c0_32], %204 {strides = array<i32>} : memref<16x64xf32, #tpu.memory_space<vmem>>, vector<2x64xf32>,
    %206 = vector.extract_strided_slice %5 {offsets = [14, 0], sizes = [2, 256], strides = [1, 1]} : vector<16x256xf32> to vector<2x256xf32>
    %207 = vector.extract_strided_slice %6 {offsets = [14, 0], sizes = [2, 64], strides = [1, 1]} : vector<16x64xf32> to vector<2x64xf32>
    %208 = arith.truncf %200 : vector<2x64xf32> to vector<2x64xbf16>
    %cst_33 = arith.constant dense<0.000000e+00> : vector<2x256xf32>
    %209 = tpu.matmul %208, %7, %cst_33 {dimension_numbers = #tpu.dot_dimension_numbers<[1], [0], [0], [1], [0, 0, 1, 1], [], []>} : vector<2x64xbf16>, vector<64x256xbf16>, vector<2x256xf32> -> vector<2x256xf32>
    %210 = arith.addf %206, %209 : vector<2x256xf32>
    %211 = arith.negf %210 : vector<2x256xf32>
    %212 = math.exp %211 : vector<2x256xf32>
    %cst_34 = arith.constant 1.000000e+00 : f32
    %213 = vector.broadcast %cst_34 : f32 to vector<2x256xf32>
    %214 = arith.addf %213, %212 : vector<2x256xf32>
    %215 = arith.divf %213, %214 : vector<2x256xf32>
    %216 = vector.extract_strided_slice %215 {offsets = [0, 0], sizes = [2, 64], strides = [1, 1]} : vector<2x256xf32> to vector<2x64xf32>
    %217 = vector.extract_strided_slice %215 {offsets = [0, 64], sizes = [2, 64], strides = [1, 1]} : vector<2x256xf32> to vector<2x64xf32>
    %218 = vector.extract_strided_slice %210 {offsets = [0, 128], sizes = [2, 64], strides = [1, 1]} : vector<2x256xf32> to vector<2x64xf32>
    %219 = math.tanh %218 : vector<2x64xf32>
    %220 = vector.extract_strided_slice %215 {offsets = [0, 192], sizes = [2, 64], strides = [1, 1]} : vector<2x256xf32> to vector<2x64xf32>
    %221 = arith.mulf %217, %203 : vector<2x64xf32>
    %222 = arith.mulf %216, %219 : vector<2x64xf32>
    %223 = arith.addf %221, %222 : vector<2x64xf32>
    %224 = math.tanh %223 : vector<2x64xf32>
    %225 = arith.mulf %220, %224 : vector<2x64xf32>
    %226 = arith.mulf %207, %225 : vector<2x64xf32>
    %c14 = arith.constant 14 : index
    %c0_35 = arith.constant 0 : index
    %227 = vector.load %arg12[%c14, %c0_35] : memref<16x64xf32, #tpu.memory_space<vmem>>, vector<2x64xf32>
    tpu.vector_store %arg12[%c14, %c0_35], %226 {strides = array<i32>} : memref<16x64xf32, #tpu.memory_space<vmem>>, vector<2x64xf32>,
    %c0_36 = arith.constant 0 : index
    %c0_37 = arith.constant 0 : index
    %228 = vector.load %arg12[%c0_36, %c0_37] : memref<16x64xf32, #tpu.memory_space<vmem>>, vector<16x64xf32>
    %229 = arith.truncf %228 : vector<16x64xf32> to vector<16x64xbf16>
    %230 = vector.extract_strided_slice %229 {offsets = [0, 0], sizes = [16, 32], strides = [1, 1]} : vector<16x64xbf16> to vector<16x32xbf16>
    %c0_38 = arith.constant 0 : index
    %c0_39 = arith.constant 0 : index
    %231 = vector.load %arg6[%c0_38, %c0_39] : memref<16x16xbf16, #tpu.memory_space<vmem>>, vector<16x16xbf16>
    %232 = vector.extract_strided_slice %229 {offsets = [0, 32], sizes = [16, 32], strides = [1, 1]} : vector<16x64xbf16> to vector<16x32xbf16>
    %cst_40 = arith.constant dense<0.000000e+00> : vector<16x32xf32>
    %233 = tpu.matmul %231, %232, %cst_40 {dimension_numbers = #tpu.dot_dimension_numbers<[1], [0], [0], [1], [0, 0, 1, 1], [], []>} : vector<16x16xbf16>, vector<16x32xbf16>, vector<16x32xf32> -> vector<16x32xf32>
    %234 = arith.truncf %233 : vector<16x32xf32> to vector<16x32xbf16>
    %c0_41 = arith.constant 0 : index
    %c0_42 = arith.constant 0 : index
    %235 = vector.load %arg7[%c0_41, %c0_42] : memref<32x128xbf16, #tpu.memory_space<vmem>>, vector<32x128xbf16>
    %cst_43 = arith.constant dense<0.000000e+00> : vector<16x128xf32>
    %236 = tpu.matmul %230, %235, %cst_43 {dimension_numbers = #tpu.dot_dimension_numbers<[1], [0], [0], [1], [0, 0, 1, 1], [], []>} : vector<16x32xbf16>, vector<32x128xbf16>, vector<16x128xf32> -> vector<16x128xf32>
    %c0_44 = arith.constant 0 : index
    %c0_45 = arith.constant 0 : index
    %237 = vector.load %arg8[%c0_44, %c0_45] : memref<32x128xbf16, #tpu.memory_space<vmem>>, vector<32x128xbf16>
    %cst_46 = arith.constant dense<0.000000e+00> : vector<16x128xf32>
    %238 = tpu.matmul %234, %237, %cst_46 {dimension_numbers = #tpu.dot_dimension_numbers<[1], [0], [0], [1], [0, 0, 1, 1], [], []>} : vector<16x32xbf16>, vector<32x128xbf16>, vector<16x128xf32> -> vector<16x128xf32>
    %239 = arith.addf %236, %238 : vector<16x128xf32>
    %c0_47 = arith.constant 0 : index
    %c0_48 = arith.constant 0 : index
    %240 = vector.load %arg9[%c0_47, %c0_48] : memref<1x128xf32, #tpu.memory_space<vmem>>, vector<1x128xf32>
    %241 = vector.broadcast %240 : vector<1x128xf32> to vector<16x128xf32>
    %242 = arith.addf %239, %241 : vector<16x128xf32>
    %cst_49 = arith.constant dense<0xFF800000> : vector<16xf32>
    %243 = vector.multi_reduction <maximumf>, %242, %cst_49 [1] : vector<16x128xf32> to vector<16xf32>
    %244 = vector.shape_cast %243 : vector<16xf32> to vector<16x1xf32>
    %245 = vector.broadcast %244 : vector<16x1xf32> to vector<16x128xf32>
    %246 = arith.subf %242, %245 : vector<16x128xf32>
    %247 = math.exp %246 : vector<16x128xf32>
    %cst_50 = arith.constant dense<0.000000e+00> : vector<16xf32>
    %248 = vector.multi_reduction <add>, %247, %cst_50 [1] : vector<16x128xf32> to vector<16xf32>
    %249 = vector.shape_cast %248 : vector<16xf32> to vector<16x1xf32>
    %250 = math.log %249 : vector<16x1xf32>
    %251 = vector.broadcast %250 : vector<16x1xf32> to vector<16x128xf32>
    %252 = arith.subf %246, %251 : vector<16x128xf32>
    %253 = tpu.iota {dimensions = array<i32: 1>} : vector<16x128xi32>
    %c0_51 = arith.constant 0 : index
    %c0_52 = arith.constant 0 : index
    %254 = vector.load %arg2[%c0_51, %c0_52] : memref<16x1xi32, #tpu.memory_space<vmem>>, vector<16x1xi32>
    %255 = vector.broadcast %254 : vector<16x1xi32> to vector<16x128xi32>
    %256 = arith.cmpi eq, %253, %255 : vector<16x128xi32>
    %257 = arith.extui %256 : vector<16x128xi1> to vector<16x128xi32>
    %258 = arith.sitofp %257 : vector<16x128xi32> to vector<16x128xf32>
    %259 = arith.mulf %252, %258 : vector<16x128xf32>
    %cst_53 = arith.constant dense<0.000000e+00> : vector<16xf32>
    %260 = vector.multi_reduction <add>, %259, %cst_53 [1] : vector<16x128xf32> to vector<16xf32>
    %261 = vector.shape_cast %260 : vector<16xf32> to vector<16x1xf32>
    %cst_54 = arith.constant 0.000000e+00 : f32
    %262 = vector.broadcast %cst_54 : f32 to vector<16x1xf32>
    %263 = arith.subf %262, %261 : vector<16x1xf32>
    %264 = vector.extract_strided_slice %6 {offsets = [0, 0], sizes = [16, 1], strides = [1, 1]} : vector<16x64xf32> to vector<16x1xf32>
    %265 = arith.mulf %263, %264 : vector<16x1xf32>
    %266 = vector.shape_cast %265 : vector<16x1xf32> to vector<1x16x1xf32>
    %cst_55 = arith.constant dense<0.000000e+00> : vector<1xf32>
    %267 = vector.multi_reduction <add>, %266, %cst_55 [1, 2] : vector<1x16x1xf32> to vector<1xf32>
    %268 = vector.shape_cast %267 : vector<1xf32> to vector<1x1x1xf32>
    %269 = vector.extract %268[0, 0, 0] : f32 from vector<1x1x1xf32>
    %270 = vector.broadcast %269 : f32 to vector<1x1xf32>
    %271 = vector.shape_cast %264 : vector<16x1xf32> to vector<1x16x1xf32>
    %cst_56 = arith.constant dense<0.000000e+00> : vector<1xf32>
    %272 = vector.multi_reduction <add>, %271, %cst_56 [1, 2] : vector<1x16x1xf32> to vector<1xf32>
    %273 = vector.shape_cast %272 : vector<1xf32> to vector<1x1x1xf32>
    %274 = vector.extract %273[0, 0, 0] : f32 from vector<1x1x1xf32>
    %275 = vector.broadcast %274 : f32 to vector<1x1xf32>
    %cst_57 = arith.constant 1.000000e+00 : f32
    %276 = vector.broadcast %cst_57 : f32 to vector<1x1xf32>
    %277 = arith.maximumf %275, %276 : vector<1x1xf32>
    %278 = arith.divf %270, %277 : vector<1x1xf32>
    %c0_58 = arith.constant 0 : index
    %c0_59 = arith.constant 0 : index
    %279 = vector.load %arg10[%c0_58, %c0_59] : memref<1x1xf32, #tpu.memory_space<vmem>>, vector<1x1xf32>
    tpu.vector_store %arg10[%c0_58, %c0_59], %278 {strides = array<i32>} : memref<1x1xf32, #tpu.memory_space<vmem>>, vector<1x1xf32>,
    %280 = vector.broadcast %244 : vector<16x1xf32> to vector<16x128xf32>
    %281 = arith.cmpf oge, %242, %280 : vector<16x128xf32>
    %c128_i32 = arith.constant 128 : i32
    %282 = vector.broadcast %c128_i32 : i32 to vector<16x128xi32>
    %283 = arith.select %281, %253, %282 : vector<16x128xi1>, vector<16x128xi32>
    %cst_60 = arith.constant dense<2147483647> : vector<16xi32>
    %284 = vector.multi_reduction <minsi>, %283, %cst_60 [1] : vector<16x128xi32> to vector<16xi32>
    %285 = vector.shape_cast %284 : vector<16xi32> to vector<16x1xi32>
    %c0_61 = arith.constant 0 : index
    %c0_62 = arith.constant 0 : index
    %286 = vector.load %arg11[%c0_61, %c0_62] : memref<16x1xi32, #tpu.memory_space<vmem>>, vector<16x1xi32>
    tpu.vector_store %arg11[%c0_61, %c0_62], %285 {strides = array<i32>} : memref<16x1xi32, #tpu.memory_space<vmem>>, vector<16x1xi32>,
    return
  }
}

</mosaic_0001>

<bundles_post_ra>
// kernel: joint_ent_model_forward.1
= control target key start
LH: loop header
LB: loop body
LE: loop exit
PB: predicated region body
PF: predicated region fallthrough
CT: control target
= control target key end

     0   :  { %v1601_v2 = vmov 0   ;;  %s2015_s0 = inlined_call_operand.vmem [shape: bf16[16,64], index: 0, kind: input, shape index: {}]   ;;  %s2016_s1 = inlined_call_operand.vmem [shape: f32[16,64], index: 1, kind: input, shape index: {}]   ;;  %s2017_s2 = inlined_call_operand.vmem [shape: s32[16,1], index: 2, kind: input, shape index: {}]   ;;  %s2018_s3 = inlined_call_operand.vmem [shape: bf16[64,256], index: 3, kind: input, shape index: {}]   ;;  %s2019_s4 = inlined_call_operand.vmem [shape: f32[1,256], index: 4, kind: input, shape index: {}]   ;;  %s2020_s5 = inlined_call_operand.vmem [shape: bf16[64,256], index: 5, kind: input, shape index: {}]   ;;  %s2021_s6 = inlined_call_operand.vmem [shape: bf16[16,16], index: 6, kind: input, shape index: {}]   ;;  %s2022_s7 = inlined_call_operand.vmem [shape: bf16[32,128], index: 7, kind: input, shape index: {}]   ;;  %s2023_s8 = inlined_call_operand.vmem [shape: bf16[32,128], index: 8, kind: input, shape index: {}]   ;;  %s2024_s9 = inlined_call_operand.vmem [shape: f32[1,128], index: 9, kind: input, shape index: {}]   ;;  %s2025_s10 = inlined_call_operand.hbm [shape: f32[1,1], index: 10, kind: output, shape index: {0}]   ;;  %s2026_s11 = inlined_call_operand.vmem [shape: s32[16,1], index: 11, kind: output, shape index: {1}]  }
   0x1   :  { %v1440_v0 = vld [vmem:[%s2018_s3 + $0x4] ss:$8 sps:$4 sm:$0xff]   ;;  %142 = vmatprep.mubr.bf16.mxu0 %v1601_v2  ;;  %238 = vmatprep.mubr.bf16.mxu1 %v1601_v2  ;;  %v1444_v3 = vld [vmem:[%s2018_s3] ss:$8 sps:$4 sm:$0xff]   ;;  %v1446_v5 = vld [vmem:[%s2018_s3 + $0x14] ss:$8 sps:$4 sm:$0xff]  }
   0x2   :  { %v1673_v1 = vld [vmem:[%s2020_s5 + $0x4] ss:$8 sps:$4 sm:$0xff]   ;;  %110 = vmatprep.subr.bf16.mxu0 %v1440_v0  ;;  %v1683_v4 = vld [vmem:[%s2020_s5] ss:$8 sps:$4 sm:$0xff]   ;;  %1438 = vset.pattern.permute.xlu0 %v1601_v2  ;;  %v1695_v6 = vld [vmem:[%s2020_s5 + $0x14] ss:$8 sps:$4 sm:$0xff]  }
   0x3   :  { %206 = vmatprep.subr.bf16.mxu1 %v1673_v1  ;;  %1439 = vset.pattern.permute.xlu1 %v1601_v2  ;;  %v1450_v7 = vld [vmem:[%s2018_s3 + $0x10] ss:$8 sps:$4 sm:$0xff]   ;;  %v1452_v9 = vld [vmem:[%s2018_s3 + $0x24] ss:$8 sps:$4 sm:$0xff]   ;;  %v1456_v11 = vld [vmem:[%s2018_s3 + $0x20] ss:$8 sps:$4 sm:$0xff]  }
   0x4   :  { %111 = vmatpush1.bf16.msra.mxu0 %v1444_v3  ;;  %207 = vmatpush1.bf16.msra.mxu1 %v1683_v4  ;;  %v1703_v8 = vld [vmem:[%s2020_s5 + $0x10] ss:$8 sps:$4 sm:$0xff]   ;;  %v1712_v10 = vld [vmem:[%s2020_s5 + $0x24] ss:$8 sps:$4 sm:$0xff]   ;;  %v1720_v12 = vld [vmem:[%s2020_s5 + $0x20] ss:$8 sps:$4 sm:$0xff]  }
   0x5   :  { %112 = vmatprep.subr.bf16.mxu0 %v1446_v5  ;;  %208 = vmatprep.subr.bf16.mxu1 %v1695_v6  ;;  %v1458_v13 = vld [vmem:[%s2018_s3 + $0x34] ss:$8 sps:$4 sm:$0xff]   ;;  %v1462_v15 = vld [vmem:[%s2018_s3 + $0x30] ss:$8 sps:$4 sm:$0xff]   ;;  %v1464_v17 = vld [vmem:[%s2015_s0] sm:$0xff]  }
   0x6   :  { %v1730_v14 = vld [vmem:[%s2020_s5 + $0x34] ss:$8 sps:$4 sm:$0xff]   ;;  %v1738_v16 = vld [vmem:[%s2020_s5 + $0x30] ss:$8 sps:$4 sm:$0xff]  }
   0x8   :  { %113 = vmatpush1.bf16.msra.mxu0 %v1450_v7  ;;  %209 = vmatpush1.bf16.msra.mxu1 %v1703_v8 }
   0x9   :  { %114 = vmatprep.subr.bf16.mxu0 %v1452_v9  ;;  %210 = vmatprep.subr.bf16.mxu1 %v1712_v10 }
   0xc   :  { %115 = vmatpush1.bf16.msra.mxu0 %v1456_v11  ;;  %211 = vmatpush1.bf16.msra.mxu1 %v1720_v12 }
   0xd   :  { %116 = vmatprep.subr.bf16.mxu0 %v1458_v13  ;;  %212 = vmatprep.subr.bf16.mxu1 %v1730_v14 }
   0xe   :  { %17 = vsyncpa [#allocation4], 0  ;;  %vm106_vm0 = vcmask 523264   ;;  %v51_v18 = vlaneseq  ;;  %v49_v21 = vld [vmem:[%s2019_s4] sm:$0x3]  ;;  %s1602_s4 = smov 64  }
   0xf   :  { %v1788_v54 = vld [vmem:[%s2016_s1] sm:$0xff]  ;;  %vm283_vm1 = vcmask 517120   ;;  %vm395_vm2 = vcmask 519170   ;;  %vm619_vm3 = vcmask 523270   ;;  %vm507_vm4 = vcmask 521220   ;;  %s1606_s3 = smov [#allocation3]  }
  0x10   :  { %117 = vmatpush1.bf16.msra.mxu0 %v1462_v15  ;;  %213 = vmatpush1.bf16.msra.mxu1 %v1738_v16  ;;  %v52_v19 = vshrl.u32 %v51_v18, 7  ;;  %vm1604_vm5 = vmmov 0   ;;  %vm1106_vm6 = vcmask 261120   ;;  %vm1040_vm7 = vcmask 130048  }
  0x11   :  { %289 = vmatprep.subr.bf16.mxu0 %v1673_v1  ;;  %401 = vmatprep.subr.bf16.mxu1 %v1673_v1  ;;  %vm1262_vm10 = vcmask 7168   ;;  %vm1292_vm15 = vcmask 0  }
  0x12   :  { %v53_v20 = vsub.s32 0, %v52_v19  ;;  %v57_v23 = vsub.s32 1, %v52_v19 }
  0x13   :  { %1355 = vmatmul.mubr.msk.bf16.vlgmr.msra.gmra.mrb[0].mxu0 %vm106_vm0, %v1464_v17  ;;  %239 = vmatmul.mubr.bf16.vlgmr.msra.gmra.mrb[0].mxu1 %v1601_v2 }
  0x14   :  { %290 = vmatpush1.bf16.msra.mxu0 %v1683_v4  ;;  %321 = vmatprep.mubr.bf16.mxu0 %v1601_v2  ;;  %v54_v22 = vrot.slane %v49_v21, %v53_v20  ;;  %v58_v29 = vrot.slane %v49_v21, %v57_v23 }
  0x15   :  { %291 = vmatprep.subr.bf16.mxu0 %v1695_v6  ;;  %402 = vmatpush1.bf16.msra.mxu1 %v1683_v4 }
  0x16   :  { %403 = vmatprep.subr.bf16.mxu1 %v1695_v6  ;;  %433 = vmatprep.mubr.bf16.mxu1 %v1601_v2 }
  0x18   :  { %292 = vmatpush1.bf16.msra.mxu0 %v1703_v8 }
  0x19   :  { %293 = vmatprep.subr.bf16.mxu0 %v1712_v10  ;;  %404 = vmatpush1.bf16.msra.mxu1 %v1703_v8 }
  0x1a   :  { %405 = vmatprep.subr.bf16.mxu1 %v1712_v10 }
  0x1c   :  { %294 = vmatpush1.bf16.msra.mxu0 %v1720_v12 }
  0x1d   :  { %295 = vmatprep.subr.bf16.mxu0 %v1730_v14  ;;  %406 = vmatpush1.bf16.msra.mxu1 %v1720_v12 }
  0x1e   :  { %407 = vmatprep.subr.bf16.mxu1 %v1730_v14 }
  0x20   :  { %296 = vmatpush1.bf16.msra.mxu0 %v1738_v16 }
  0x21   :  { %408 = vmatpush1.bf16.msra.mxu1 %v1738_v16  ;;  %513 = vmatprep.subr.bf16.mxu0 %v1673_v1 }
  0x22   :  { %625 = vmatprep.subr.bf16.mxu1 %v1673_v1 }
  0xe6   :  { %v144_v24 = vpop.f32.mrb[0].mxu0  ;;  %v240_v25 = vpop.f32.mrb[0].mxu1 }
  0xe7   :  { %v1772_v26 = vadd.f32 %v144_v24, %v54_v22  ;;  %v146_v27 = vpop.f32.mrb[1].mxu0  ;;  %v242_v28 = vpop.f32.mrb[1].mxu1 }
  0xe8   :  { %v148_v30 = vpop.f32.mrb[2].mxu0  ;;  %v244_v31 = vpop.f32.mrb[2].mxu1  ;;  %v1779_v38 = vadd.f32 %v146_v27, %v58_v29 }
  0xe9   :  { %v247_v32 = vadd.f32 %v240_v25, %v1772_v26  ;;  %v1775_v33 = vadd.f32 %v148_v30, %v54_v22  ;;  %v150_v34 = vpop.f32.mrb[3].mxu0  ;;  %v245_v35 = vpop.f32.mrb[3].mxu1 }
  0xea   :  { %v1777_v36 = vadd.f32 %v150_v34, %v58_v29  ;;  %v248_v39 = vadd.f32 %v242_v28, %v1779_v38 }
  0xeb   :  { %v1364_v37 = vmul.f32 -1.442695, %v247_v32 }
  0xec   :  { %v1365_v45 = vmul.f32 -1.442695, %v248_v39 }
  0xed   :  { %1470 = vpow2.f32 %v1364_v37 }
  0xee   :  { %1472 = vtanh.f32 %v248_v39 }
  0xf7   :  { %v1471_v40 = vpop.eup %1470 }
  0xf8   :  { %v255_v41 = vadd.f32 1.0, %v1471_v40  ;;  %v1473_v42 = vpop.eup %1472 }
  0xfa   :  { %1474 = vrcp.f32 %v255_v41 }
  0xfb   :  { %1476 = vpow2.f32 %v1365_v45 }
 0x104   :  { %v1475_v43 = vpop.eup %1474 }
 0x105   :  { %v263_v44 = vmul.f32 %v1475_v43, %v1473_v42  ;;  %v1477_v46 = vpop.eup %1476  ;;  %v262_v48 = vmul.f32 0.0, %v1475_v43 }
 0x106   :  { %v256_v47 = vadd.f32 1.0, %v1477_v46 }
 0x107   :  { %265 = vrot.lane.b32.xlu0 %v263_v44, %s1602_s4 }
 0x108   :  { %1478 = vrcp.f32 %v256_v47 }
 0x112   :  { %v1479_v51 = vpop.eup %1478 }
 0x179   :  { %v266_v49 = vpop.permute.xlu0 %265 }
 0x17a   :  { %v268_v50 = vadd.f32 %v266_v49, %v262_v48 }
 0x17c   :  { %1480 = vtanh.f32 %v268_v50  ;;  %278 = vrot.lane.b32.xlu1 %v268_v50, %s1602_s4 }
 0x186   :  { %v1481_v52 = vpop.eup %1480 }
 0x187   :  { %v270_v53 = vmul.f32 %v1481_v52, %v1479_v51 }
 0x189   :  { %272 = vrot.lane.b32.xlu0 %v270_v53, %s1602_s4 }
 0x1ee   :  { %v279_v55 = vpop.permute.xlu1 %278 }
 0x1ef   :  { %v281_v56 = vmul.f32 %v279_v55, %v1788_v54 }
 0x1f1   :  { %v352_v57 = vrot.slane %v281_v56, 6 }
 0x1f3   :  { %353 = vrot.lane.b32.xlu1 %v352_v57, %s1602_s4 }
 0x1fb   :  { %v273_v58 = vpop.permute.xlu0 %272 }
 0x1fc   :  { %v275_v59 = vmul.f32 %v273_v58, %v1788_v54 }
 0x1fe   :  { %v285_v60 = vpack.c.bf16 %v275_v59, %v275_v59  ;;  %v366_v61 = vrot.slane %v275_v59, 6  ;;  %284 = vst.msk [vmem:[#allocation2] sm:$0x3] %vm283_vm1, %v275_v59 }
 0x200   :  { %367 = vrot.lane.b32.xlu1 %v366_v61, %s1602_s4  ;;  %1366 = vmatmul.mubr.msk.bf16.vlgmr.msra.gmra.mrb[4].mxu0 %vm106_vm0, %v285_v60 }
 0x201   :  { %514 = vmatpush1.bf16.msra.mxu0 %v1683_v4  ;;  %545 = vmatprep.mubr.bf16.mxu0 %v1601_v2 }
 0x202   :  { %515 = vmatprep.subr.bf16.mxu0 %v1695_v6 }
 0x205   :  { %516 = vmatpush1.bf16.msra.mxu0 %v1703_v8 }
 0x206   :  { %517 = vmatprep.subr.bf16.mxu0 %v1712_v10 }
 0x209   :  { %518 = vmatpush1.bf16.msra.mxu0 %v1720_v12 }
 0x20a   :  { %519 = vmatprep.subr.bf16.mxu0 %v1730_v14 }
 0x20d   :  { %520 = vmatpush1.bf16.msra.mxu0 %v1738_v16 }
 0x20e   :  { %722 = vmatprep.subr.bf16.mxu0 %v1673_v1 }
 0x265   :  { %v354_v24 = vpop.permute.xlu1 %353 }
 0x272   :  { %v368_v35 = vpop.permute.xlu1 %367 }
 0x2d3   :  { %v323_v62 = vpop.f32.mrb[4].mxu0 }
 0x2d4   :  { %v332_v63 = vrot.slane %v323_v62, 6  ;;  %v325_v0 = vpop.f32.mrb[5].mxu0 }
 0x2d5   :  { %v327_v3 = vpop.f32.mrb[6].mxu0  ;;  %v333_v11 = vrot.slane %v325_v0, 6 }
 0x2d6   :  { %v336_v5 = vadd.f32 %v332_v63, %v1772_v26  ;;  %v328_v7 = vpop.f32.mrb[7].mxu0 }
 0x2d7   :  { %v337_v13 = vadd.f32 %v333_v11, %v1779_v38 }
 0x2d8   :  { %v1367_v9 = vmul.f32 -1.442695, %v336_v5 }
 0x2d9   :  { %v1368_v22 = vmul.f32 -1.442695, %v337_v13 }
 0x2da   :  { %1482 = vpow2.f32 %v1367_v9 }
 0x2db   :  { %1484 = vtanh.f32 %v337_v13 }
 0x2e4   :  { %v1483_v15 = vpop.eup %1482 }
 0x2e5   :  { %v344_v17 = vadd.f32 1.0, %v1483_v15  ;;  %v1485_v19 = vpop.eup %1484 }
 0x2e7   :  { %1486 = vrcp.f32 %v344_v17 }
 0x2e8   :  { %1488 = vpow2.f32 %v1368_v22 }
 0x2f1   :  { %v1487_v20 = vpop.eup %1486 }
 0x2f2   :  { %v357_v21 = vmul.f32 %v1487_v20, %v1485_v19  ;;  %v1489_v23 = vpop.eup %1488  ;;  %v356_v27 = vmul.f32 %v1487_v20, %v354_v24 }
 0x2f3   :  { %v345_v25 = vadd.f32 1.0, %v1489_v23 }
 0x2f4   :  { %359 = vrot.lane.b32.xlu0 %v357_v21, %s1602_s4 }
 0x2f5   :  { %1490 = vrcp.f32 %v345_v25 }
 0x2ff   :  { %v1491_v31 = vpop.eup %1490 }
 0x366   :  { %v360_v28 = vpop.permute.xlu0 %359 }
 0x367   :  { %v362_v29 = vadd.f32 %v360_v28, %v356_v27 }
 0x369   :  { %1492 = vtanh.f32 %v362_v29  ;;  %v380_v30 = vsub.f32 %v362_v29, %v354_v24 }
 0x36b   :  { %382 = vrot.lane.b32.xlu1 %v380_v30, %s1602_s4 }
 0x373   :  { %v1493_v32 = vpop.eup %1492 }
 0x374   :  { %v1809_v34 = vmul.f32 %v1493_v32, %v1491_v31 }
 0x376   :  { %v370_v37 = vsub.f32 %v1809_v34, %v368_v35 }
 0x378   :  { %372 = vrot.lane.b32.xlu0 %v370_v37, %s1602_s4 }
 0x3dd   :  { %v383_v39 = vpop.permute.xlu1 %382 }
 0x3de   :  { %v385_v40 = vmul.f32 %v383_v39, %v1788_v54 }
 0x3e0   :  { %v387_v41 = vrot.slane %v385_v40, 2 }
 0x3e2   :  { %v389_v42 = vadd.f32 %v387_v41, %v281_v56 }
 0x3e4   :  { %v464_v43 = vrot.slane %v389_v42, 4 }
 0x3e6   :  { %465 = vrot.lane.b32.xlu0 %v464_v43, %s1602_s4 }
 0x3ea   :  { %v373_v44 = vpop.permute.xlu0 %372 }
 0x3eb   :  { %v375_v45 = vmul.f32 %v373_v44, %v1788_v54 }
 0x3ed   :  { %v377_v46 = vrot.slane %v375_v45, 2 }
 0x3ef   :  { %v379_v47 = vadd.f32 %v377_v46, %v275_v59 }
 0x3f1   :  { %v397_v48 = vpack.c.bf16 %v379_v47, %v379_v47  ;;  %v478_v49 = vrot.slane %v379_v47, 4 }
 0x3f3   :  { %479 = vrot.lane.b32.xlu0 %v478_v49, %s1602_s4  ;;  %1369 = vmatmul.mubr.msk.bf16.vlgmr.msra.gmra.mrb[4].mxu1 %vm106_vm0, %v397_v48 }
 0x3f4   :  { %626 = vmatpush1.bf16.msra.mxu1 %v1683_v4  ;;  %657 = vmatprep.mubr.bf16.mxu1 %v1601_v2 }
 0x3f5   :  { %627 = vmatprep.subr.bf16.mxu1 %v1695_v6 }
 0x3f8   :  { %628 = vmatpush1.bf16.msra.mxu1 %v1703_v8 }
 0x3f9   :  { %629 = vmatprep.subr.bf16.mxu1 %v1712_v10 }
 0x3fc   :  { %630 = vmatpush1.bf16.msra.mxu1 %v1720_v12 }
 0x3fd   :  { %631 = vmatprep.subr.bf16.mxu1 %v1730_v14 }
 0x400   :  { %632 = vmatpush1.bf16.msra.mxu1 %v1738_v16 }
 0x401   :  { %833 = vmatprep.subr.bf16.mxu1 %v1673_v1 }
 0x458   :  { %v466_v7 = vpop.permute.xlu0 %465 }
 0x465   :  { %v480_v22 = vpop.permute.xlu0 %479 }
 0x4c6   :  { %v435_v50 = vpop.f32.mrb[4].mxu1 }
 0x4c7   :  { %v444_v51 = vrot.slane %v435_v50, 4  ;;  %v437_v52 = vpop.f32.mrb[5].mxu1 }
 0x4c8   :  { %v439_v53 = vpop.f32.mrb[6].mxu1  ;;  %v445_v58 = vrot.slane %v437_v52, 4 }
 0x4c9   :  { %v448_v55 = vadd.f32 %v444_v51, %v1772_v26  ;;  %v440_v56 = vpop.f32.mrb[7].mxu1 }
 0x4ca   :  { %v449_v59 = vadd.f32 %v445_v58, %v1779_v38 }
 0x4cb   :  { %v1370_v57 = vmul.f32 -1.442695, %v448_v55 }
 0x4cc   :  { %v1371_v3 = vmul.f32 -1.442695, %v449_v59 }
 0x4cd   :  { %1494 = vpow2.f32 %v1370_v57 }
 0x4ce   :  { %1496 = vtanh.f32 %v449_v59 }
 0x4d7   :  { %v1495_v60 = vpop.eup %1494 }
 0x4d8   :  { %v456_v61 = vadd.f32 1.0, %v1495_v60  ;;  %v1497_v62 = vpop.eup %1496 }
 0x4da   :  { %1498 = vrcp.f32 %v456_v61 }
 0x4db   :  { %1500 = vpow2.f32 %v1371_v3 }
 0x4e4   :  { %v1499_v63 = vpop.eup %1498 }
 0x4e5   :  { %v469_v0 = vmul.f32 %v1499_v63, %v1497_v62  ;;  %v1501_v5 = vpop.eup %1500  ;;  %v468_v11 = vmul.f32 %v1499_v63, %v466_v7 }
 0x4e6   :  { %v457_v9 = vadd.f32 1.0, %v1501_v5 }
 0x4e7   :  { %471 = vrot.lane.b32.xlu1 %v469_v0, %s1602_s4 }
 0x4e8   :  { %1502 = vrcp.f32 %v457_v9 }
 0x4f2   :  { %v1503_v19 = vpop.eup %1502 }
 0x559   :  { %v472_v13 = vpop.permute.xlu1 %471 }
 0x55a   :  { %v474_v15 = vadd.f32 %v472_v13, %v468_v11 }
 0x55c   :  { %1504 = vtanh.f32 %v474_v15  ;;  %v492_v17 = vsub.f32 %v474_v15, %v466_v7 }
 0x55e   :  { %494 = vrot.lane.b32.xlu0 %v492_v17, %s1602_s4 }
 0x566   :  { %v1505_v20 = vpop.eup %1504 }
 0x567   :  { %v1831_v21 = vmul.f32 %v1505_v20, %v1503_v19 }
 0x569   :  { %v482_v23 = vsub.f32 %v1831_v21, %v480_v22 }
 0x56b   :  { %484 = vrot.lane.b32.xlu1 %v482_v23, %s1602_s4 }
 0x5d0   :  { %v495_v24 = vpop.permute.xlu0 %494 }
 0x5d1   :  { %v497_v25 = vmul.f32 %v495_v24, %v1788_v54 }
 0x5d3   :  { %v499_v27 = vrot.slane %v497_v25, 4 }
 0x5d5   :  { %v501_v28 = vadd.f32 %v499_v27, %v389_v42 }
 0x5d7   :  { %v576_v29 = vrot.slane %v501_v28, 2 }
 0x5d9   :  { %577 = vrot.lane.b32.xlu1 %v576_v29, %s1602_s4 }
 0x5dd   :  { %v485_v30 = vpop.permute.xlu1 %484 }
 0x5de   :  { %v487_v31 = vmul.f32 %v485_v30, %v1788_v54 }
 0x5e0   :  { %v489_v32 = vrot.slane %v487_v31, 4 }
 0x5e2   :  { %v491_v35 = vadd.f32 %v489_v32, %v379_v47 }
 0x5e4   :  { %v509_v37 = vpack.c.bf16 %v491_v35, %v491_v35  ;;  %v590_v39 = vrot.slane %v491_v35, 2 }
 0x5e6   :  { %1372 = vmatmul.mubr.msk.bf16.vlgmr.msra.gmra.mrb[8].mxu0 %vm106_vm0, %v509_v37  ;;  %591 = vrot.lane.b32.xlu1 %v590_v39, %s1602_s4 }
 0x5e7   :  { %723 = vmatpush1.bf16.msra.mxu0 %v1683_v4  ;;  %754 = vmatprep.mubr.bf16.mxu0 %v1601_v2 }
 0x5e8   :  { %724 = vmatprep.subr.bf16.mxu0 %v1695_v6 }
 0x5eb   :  { %725 = vmatpush1.bf16.msra.mxu0 %v1703_v8 }
 0x5ec   :  { %726 = vmatprep.subr.bf16.mxu0 %v1712_v10 }
 0x5ef   :  { %727 = vmatpush1.bf16.msra.mxu0 %v1720_v12 }
 0x5f0   :  { %728 = vmatprep.subr.bf16.mxu0 %v1730_v14 }
 0x5f3   :  { %729 = vmatpush1.bf16.msra.mxu0 %v1738_v16 }
 0x5f4   :  { %944 = vmatprep.subr.bf16.mxu0 %v1673_v1 }
 0x64b   :  { %v578_v56 = vpop.permute.xlu1 %577 }
 0x658   :  { %v592_v63 = vpop.permute.xlu1 %591 }
 0x6b9   :  { %v547_v40 = vpop.f32.mrb[8].mxu0 }
 0x6ba   :  { %v556_v41 = vrot.slane %v547_v40, 2  ;;  %v549_v42 = vpop.f32.mrb[9].mxu0 }
 0x6bb   :  { %v551_v43 = vpop.f32.mrb[10].mxu0  ;;  %v557_v47 = vrot.slane %v549_v42, 2 }
 0x6bc   :  { %v560_v44 = vadd.f32 %v556_v41, %v1772_v26  ;;  %v552_v45 = vpop.f32.mrb[11].mxu0 }
 0x6bd   :  { %v561_v48 = vadd.f32 %v557_v47, %v1779_v38 }
 0x6be   :  { %v1373_v46 = vmul.f32 -1.442695, %v560_v44 }
 0x6bf   :  { %v1374_v1 = vmul.f32 -1.442695, %v561_v48 }
 0x6c0   :  { %1506 = vpow2.f32 %v1373_v46 }
 0x6c1   :  { %1508 = vtanh.f32 %v561_v48 }
 0x6ca   :  { %v1507_v49 = vpop.eup %1506 }
 0x6cb   :  { %v568_v50 = vadd.f32 1.0, %v1507_v49  ;;  %v1509_v51 = vpop.eup %1508 }
 0x6cd   :  { %1510 = vrcp.f32 %v568_v50 }
 0x6ce   :  { %1512 = vpow2.f32 %v1374_v1 }
 0x6d7   :  { %v1511_v52 = vpop.eup %1510 }
 0x6d8   :  { %v581_v53 = vmul.f32 %v1511_v52, %v1509_v51  ;;  %v1513_v55 = vpop.eup %1512  ;;  %v580_v57 = vmul.f32 %v1511_v52, %v578_v56  ;;  %v1881_v51 = vld [vmem:[%s2016_s1 + $0x8] sm:$0xff] }
 0x6d9   :  { %v569_v26 = vadd.f32 1.0, %v1513_v55 }
 0x6da   :  { %583 = vrot.lane.b32.xlu0 %v581_v53, %s1602_s4 }
 0x6db   :  { %1514 = vrcp.f32 %v569_v26 }
 0x6e5   :  { %v1515_v60 = vpop.eup %1514 }
 0x74c   :  { %v584_v58 = vpop.permute.xlu0 %583 }
 0x74d   :  { %v586_v59 = vadd.f32 %v584_v58, %v580_v57 }
 0x74f   :  { %1516 = vtanh.f32 %v586_v59  ;;  %v604_v38 = vsub.f32 %v586_v59, %v578_v56 }
 0x751   :  { %606 = vrot.lane.b32.xlu1 %v604_v38, %s1602_s4 }
 0x759   :  { %v1517_v61 = vpop.eup %1516 }
 0x75a   :  { %v1853_v62 = vmul.f32 %v1517_v61, %v1515_v60 }
 0x75c   :  { %v594_v0 = vsub.f32 %v1853_v62, %v592_v63 }
 0x75e   :  { %596 = vrot.lane.b32.xlu0 %v594_v0, %s1602_s4 }
 0x7c3   :  { %v607_v3 = vpop.permute.xlu1 %606 }
 0x7c4   :  { %v609_v5 = vmul.f32 %v607_v3, %v1788_v54 }
 0x7c6   :  { %v611_v7 = vrot.slane %v609_v5, 6 }
 0x7c8   :  { %v613_v9 = vadd.f32 %v611_v7, %v501_v28 }
 0x7ca   :  { %682 = vrot.lane.b32.xlu0 %v613_v9, %s1602_s4 }
 0x7d0   :  { %v597_v11 = vpop.permute.xlu0 %596 }
 0x7d1   :  { %v599_v13 = vmul.f32 %v597_v11, %v1788_v54 }
 0x7d3   :  { %v601_v15 = vrot.slane %v599_v13, 6 }
 0x7d5   :  { %v603_v17 = vadd.f32 %v601_v15, %v491_v35 }
 0x7d7   :  { %v621_v19 = vpack.c.bf16 %v603_v17, %v603_v17  ;;  %695 = vrot.lane.b32.xlu0 %v603_v17, %s1602_s4 }
 0x7d9   :  { %1375 = vmatmul.mubr.msk.bf16.vlgmr.msra.gmra.mrb[8].mxu1 %vm106_vm0, %v621_v19 }
 0x7da   :  { %834 = vmatpush1.bf16.msra.mxu1 %v1683_v4  ;;  %865 = vmatprep.mubr.bf16.mxu1 %v1601_v2 }
 0x7db   :  { %835 = vmatprep.subr.bf16.mxu1 %v1695_v6 }
 0x7de   :  { %836 = vmatpush1.bf16.msra.mxu1 %v1703_v8 }
 0x7df   :  { %837 = vmatprep.subr.bf16.mxu1 %v1712_v10 }
 0x7e2   :  { %838 = vmatpush1.bf16.msra.mxu1 %v1720_v12 }
 0x7e3   :  { %839 = vmatprep.subr.bf16.mxu1 %v1730_v14 }
 0x7e6   :  { %840 = vmatpush1.bf16.msra.mxu1 %v1738_v16 }
 0x83c   :  { %v683_v40 = vpop.permute.xlu0 %682 }
 0x849   :  { %v696_v49 = vpop.permute.xlu0 %695 }
 0x8ac   :  { %v659_v20 = vpop.f32.mrb[8].mxu1 }
 0x8ad   :  { %v666_v22 = vadd.f32 %v659_v20, %v1775_v33  ;;  %v661_v23 = vpop.f32.mrb[9].mxu1 }
 0x8ae   :  { %v663_v24 = vpop.f32.mrb[10].mxu1  ;;  %v667_v28 = vadd.f32 %v661_v23, %v1777_v36 }
 0x8af   :  { %v1376_v25 = vmul.f32 -1.442695, %v666_v22  ;;  %v664_v27 = vpop.f32.mrb[11].mxu1 }
 0x8b0   :  { %v1377_v37 = vmul.f32 -1.442695, %v667_v28 }
 0x8b1   :  { %1518 = vpow2.f32 %v1376_v25 }
 0x8b2   :  { %1520 = vtanh.f32 %v667_v28 }
 0x8bb   :  { %v1519_v29 = vpop.eup %1518 }
 0x8bc   :  { %v674_v30 = vadd.f32 1.0, %v1519_v29  ;;  %v1521_v31 = vpop.eup %1520 }
 0x8be   :  { %1522 = vrcp.f32 %v674_v30 }
 0x8bf   :  { %1524 = vpow2.f32 %v1377_v37 }
 0x8c8   :  { %v1523_v32 = vpop.eup %1522 }
 0x8c9   :  { %v686_v35 = vmul.f32 %v1523_v32, %v1521_v31  ;;  %v1525_v39 = vpop.eup %1524  ;;  %v685_v42 = vmul.f32 %v1523_v32, %v683_v40 }
 0x8ca   :  { %v675_v41 = vadd.f32 1.0, %v1525_v39 }
 0x8cb   :  { %688 = vrot.lane.b32.xlu1 %v686_v35, %s1602_s4 }
 0x8cc   :  { %1526 = vrcp.f32 %v675_v41 }
 0x8d6   :  { %v1527_v46 = vpop.eup %1526 }
 0x93d   :  { %v689_v43 = vpop.permute.xlu1 %688 }
 0x93e   :  { %v691_v44 = vadd.f32 %v689_v43, %v685_v42 }
 0x940   :  { %1528 = vtanh.f32 %v691_v44  ;;  %v705_v45 = vsub.f32 %v691_v44, %v683_v40 }
 0x942   :  { %707 = vrot.lane.b32.xlu0 %v705_v45, %s1602_s4 }
 0x94a   :  { %v1529_v47 = vpop.eup %1528 }
 0x94b   :  { %v1874_v48 = vmul.f32 %v1529_v47, %v1527_v46 }
 0x94d   :  { %v698_v50 = vsub.f32 %v1874_v48, %v696_v49 }
 0x94f   :  { %700 = vrot.lane.b32.xlu1 %v698_v50, %s1602_s4 }
 0x9b4   :  { %v708_v52 = vpop.permute.xlu0 %707 }
 0x9b5   :  { %v710_v53 = vmul.f32 %v708_v52, %v1881_v51 }
 0x9b7   :  { %v711_v1 = vadd.f32 %v710_v53, %v613_v9 }
 0x9b9   :  { %v785_v55 = vrot.slane %v711_v1, 6 }
 0x9bb   :  { %786 = vrot.lane.b32.xlu1 %v785_v55, %s1602_s4 }
 0x9c1   :  { %v701_v56 = vpop.permute.xlu1 %700 }
 0x9c2   :  { %v703_v26 = vmul.f32 %v701_v56, %v1881_v51 }
 0x9c4   :  { %v704_v57 = vadd.f32 %v703_v26, %v603_v17 }
 0x9c6   :  { %v718_v58 = vpack.c.bf16 %v704_v57, %v704_v57  ;;  %v799_v59 = vrot.slane %v704_v57, 6 }
 0x9c8   :  { %1378 = vmatmul.mubr.msk.bf16.vlgmr.msra.gmra.mrb[12].mxu0 %vm106_vm0, %v718_v58  ;;  %800 = vrot.lane.b32.xlu1 %v799_v59, %s1602_s4 }
 0x9c9   :  { %945 = vmatpush1.bf16.msra.mxu0 %v1683_v4  ;;  %976 = vmatprep.mubr.bf16.mxu0 %v1601_v2 }
 0x9ca   :  { %946 = vmatprep.subr.bf16.mxu0 %v1695_v6 }
 0x9cd   :  { %947 = vmatpush1.bf16.msra.mxu0 %v1703_v8 }
 0x9ce   :  { %948 = vmatprep.subr.bf16.mxu0 %v1712_v10 }
 0x9d1   :  { %949 = vmatpush1.bf16.msra.mxu0 %v1720_v12 }
 0x9d2   :  { %950 = vmatprep.subr.bf16.mxu0 %v1730_v14 }
 0x9d5   :  { %951 = vmatpush1.bf16.msra.mxu0 %v1738_v16 }
 0xa2d   :  { %v787_v9 = vpop.permute.xlu1 %786 }
 0xa3a   :  { %v801_v24 = vpop.permute.xlu1 %800 }
 0xa9b   :  { %v756_v38 = vpop.f32.mrb[12].mxu0 }
 0xa9c   :  { %v765_v60 = vrot.slane %v756_v38, 6  ;;  %v758_v61 = vpop.f32.mrb[13].mxu0 }
 0xa9d   :  { %v760_v63 = vpop.f32.mrb[14].mxu0  ;;  %v766_v6 = vrot.slane %v758_v61, 6 }
 0xa9e   :  { %v769_v4 = vadd.f32 %v765_v60, %v1775_v33  ;;  %v761_v0 = vpop.f32.mrb[15].mxu0 }
 0xa9f   :  { %v770_v8 = vadd.f32 %v766_v6, %v1777_v36 }
 0xaa0   :  { %v1379_v2 = vmul.f32 -1.442695, %v769_v4 }
 0xaa1   :  { %v1380_v16 = vmul.f32 -1.442695, %v770_v8 }
 0xaa2   :  { %1530 = vpow2.f32 %v1379_v2 }
 0xaa3   :  { %1532 = vtanh.f32 %v770_v8 }
 0xaac   :  { %v1531_v3 = vpop.eup %1530 }
 0xaad   :  { %v777_v10 = vadd.f32 1.0, %v1531_v3  ;;  %v1533_v12 = vpop.eup %1532 }
 0xaaf   :  { %1534 = vrcp.f32 %v777_v10 }
 0xab0   :  { %1536 = vpow2.f32 %v1380_v16 }
 0xab9   :  { %v1535_v14 = vpop.eup %1534 }
 0xaba   :  { %v790_v5 = vmul.f32 %v1535_v14, %v1533_v12  ;;  %v1537_v7 = vpop.eup %1536  ;;  %v789_v13 = vmul.f32 %v1535_v14, %v787_v9 }
 0xabb   :  { %v778_v11 = vadd.f32 1.0, %v1537_v7 }
 0xabc   :  { %792 = vrot.lane.b32.xlu0 %v790_v5, %s1602_s4 }
 0xabd   :  { %1538 = vrcp.f32 %v778_v11 }
 0xac7   :  { %v1539_v20 = vpop.eup %1538 }
 0xb2e   :  { %v793_v15 = vpop.permute.xlu0 %792 }
 0xb2f   :  { %v795_v17 = vadd.f32 %v793_v15, %v789_v13 }
 0xb31   :  { %1540 = vtanh.f32 %v795_v17  ;;  %v813_v19 = vsub.f32 %v795_v17, %v787_v9 }
 0xb33   :  { %815 = vrot.lane.b32.xlu1 %v813_v19, %s1602_s4 }
 0xb3b   :  { %v1541_v22 = vpop.eup %1540 }
 0xb3c   :  { %v1900_v23 = vmul.f32 %v1541_v22, %v1539_v20 }
 0xb3e   :  { %v803_v25 = vsub.f32 %v1900_v23, %v801_v24 }
 0xb40   :  { %805 = vrot.lane.b32.xlu0 %v803_v25, %s1602_s4 }
 0xba5   :  { %v816_v27 = vpop.permute.xlu1 %815 }
 0xba6   :  { %v818_v28 = vmul.f32 %v816_v27, %v1881_v51 }
 0xba8   :  { %v820_v29 = vrot.slane %v818_v28, 2 }
 0xbaa   :  { %v822_v30 = vadd.f32 %v820_v29, %v711_v1 }
 0xbac   :  { %v896_v31 = vrot.slane %v822_v30, 4 }
 0xbae   :  { %897 = vrot.lane.b32.xlu0 %v896_v31, %s1602_s4 }
 0xbb2   :  { %v806_v32 = vpop.permute.xlu0 %805 }
 0xbb3   :  { %v808_v35 = vmul.f32 %v806_v32, %v1881_v51 }
 0xbb5   :  { %v810_v37 = vrot.slane %v808_v35, 2 }
 0xbb7   :  { %v812_v39 = vadd.f32 %v810_v37, %v704_v57 }
 0xbb9   :  { %v829_v40 = vpack.c.bf16 %v812_v39, %v812_v39  ;;  %v910_v41 = vrot.slane %v812_v39, 4 }
 0xbbb   :  { %911 = vrot.lane.b32.xlu0 %v910_v41, %s1602_s4  ;;  %1381 = vmatmul.mubr.msk.bf16.vlgmr.msra.gmra.mrb[12].mxu1 %vm106_vm0, %v829_v40 }
 0xc20   :  { %v898_v59 = vpop.permute.xlu0 %897 }
 0xc2d   :  { %v912_v8 = vpop.permute.xlu0 %911 }
 0xc8e   :  { %v867_v42 = vpop.f32.mrb[12].mxu1 }
 0xc8f   :  { %v876_v43 = vrot.slane %v867_v42, 4  ;;  %v869_v44 = vpop.f32.mrb[13].mxu1 }
 0xc90   :  { %v871_v45 = vpop.f32.mrb[14].mxu1  ;;  %v877_v50 = vrot.slane %v869_v44, 4 }
 0xc91   :  { %v880_v46 = vadd.f32 %v876_v43, %v1775_v33  ;;  %v872_v47 = vpop.f32.mrb[15].mxu1 }
 0xc92   :  { %v881_v52 = vadd.f32 %v877_v50, %v1777_v36  ;;  %v1466_v50 = vld [vmem:[%s2022_s7 + $0x8] sm:$0xff]  }
 0xc93   :  { %v1382_v49 = vmul.f32 -1.442695, %v880_v46 }
 0xc94   :  { %v1383_v57 = vmul.f32 -1.442695, %v881_v52 }
 0xc95   :  { %1542 = vpow2.f32 %v1382_v49 }
 0xc96   :  { %1544 = vtanh.f32 %v881_v52 }
 0xc9f   :  { %v1543_v53 = vpop.eup %1542 }
 0xca0   :  { %v888_v1 = vadd.f32 1.0, %v1543_v53  ;;  %v1545_v55 = vpop.eup %1544 }
 0xca2   :  { %1546 = vrcp.f32 %v888_v1 }
 0xca3   :  { %1548 = vpow2.f32 %v1383_v57 }
 0xcac   :  { %v1547_v56 = vpop.eup %1546 }
 0xcad   :  { %v901_v26 = vmul.f32 %v1547_v56, %v1545_v55  ;;  %v1549_v58 = vpop.eup %1548  ;;  %v900_v60 = vmul.f32 %v1547_v56, %v898_v59 }
 0xcae   :  { %v889_v38 = vadd.f32 1.0, %v1549_v58 }
 0xcaf   :  { %903 = vrot.lane.b32.xlu1 %v901_v26, %s1602_s4 }
 0xcb0   :  { %1550 = vrcp.f32 %v889_v38 }
 0xcba   :  { %v1551_v0 = vpop.eup %1550 }
 0xd21   :  { %v904_v61 = vpop.permute.xlu1 %903 }
 0xd22   :  { %v906_v63 = vadd.f32 %v904_v61, %v900_v60 }
 0xd24   :  { %1552 = vtanh.f32 %v906_v63  ;;  %v924_v4 = vsub.f32 %v906_v63, %v898_v59 }
 0xd26   :  { %926 = vrot.lane.b32.xlu0 %v924_v4, %s1602_s4  ;;  %v1467_v4 = vld [vmem:[%s2021_s6] sm:$0xff]  }
 0xd2e   :  { %v1553_v2 = vpop.eup %1552 }
 0xd2f   :  { %v908_v6 = vmul.f32 %v1553_v2, %v1551_v0  ;;  %v1468_v0 = vld [vmem:[%s2023_s8] sm:$0xff]   ;;  %v1469_v2 = vld [vmem:[%s2023_s8 + $0x8] sm:$0xff]  }
 0xd31   :  { %v914_v3 = vsub.f32 %v908_v6, %v912_v8 }
 0xd33   :  { %916 = vrot.lane.b32.xlu1 %v914_v3, %s1602_s4 }
 0xd98   :  { %v927_v10 = vpop.permute.xlu0 %926 }
 0xd99   :  { %v929_v12 = vmul.f32 %v927_v10, %v1881_v51 }
 0xd9b   :  { %v931_v14 = vrot.slane %v929_v12, 4 }
 0xd9d   :  { %v933_v5 = vadd.f32 %v931_v14, %v822_v30 }
 0xd9f   :  { %v1007_v16 = vrot.slane %v933_v5, 2 }
 0xda1   :  { %1008 = vrot.lane.b32.xlu1 %v1007_v16, %s1602_s4 }
 0xda5   :  { %v917_v7 = vpop.permute.xlu1 %916  ;;  %391 = vrot.lane.b32.xlu1 %v1809_v34, %s1602_s4 }
 0xda6   :  { %v919_v9 = vmul.f32 %v917_v7, %v1881_v51 }
 0xda8   :  { %v921_v11 = vrot.slane %v919_v9, 4 }
 0xda9   :  { %615 = vrot.lane.b32.xlu1 %v1853_v62, %s1602_s4 }
 0xdaa   :  { %v923_v13 = vadd.f32 %v921_v11, %v812_v39  ;;  %v1395_v11 = vld [vmem:[%s2024_s9] ss:$0 sm:$0xff] }
 0xdac   :  { %v940_v15 = vpack.c.bf16 %v923_v13, %v923_v13 }
 0xdad   :  { %824 = vrot.lane.b32.xlu1 %v1900_v23, %s1602_s4 }
 0xdae   :  { %1384 = vmatmul.mubr.msk.bf16.vlgmr.msra.gmra.mrb[16].mxu0 %vm106_vm0, %v940_v15 }
 0xe13   :  { %v1009_v17 = vpop.permute.xlu1 %1008 }
 0xe17   :  { %v392_v19 = vpop.permute.xlu1 %391 }
 0xe18   :  { %v394_v20 = vmul.f32 %v392_v19, %v1788_v54 }
 0xe1a   :  { %396 = vst.msk [vmem:[#allocation2] sm:$0xc] %vm395_vm2, %v394_v20 }
 0xe1b   :  { %v616_v34 = vpop.permute.xlu1 %615 }
 0xe1c   :  { %v618_v22 = vmul.f32 %v616_v34, %v1788_v54 }
 0xe1e   :  { %620 = vst.msk [vmem:[#allocation2] sm:$0xc0] %vm619_vm3, %v618_v22 }
 0xe1f   :  { %v825_v62 = vpop.permute.xlu1 %824 }
 0xe20   :  { %v827_v24 = vmul.f32 %v825_v62, %v1881_v51 }
 0xe22   :  { %828 = vst.msk [vmem:[#allocation2 + $0x8] sm:$0xc] %vm395_vm2, %v827_v24 }
 0xe81   :  { %v978_v25 = vpop.f32.mrb[16].mxu0 }
 0xe82   :  { %v987_v23 = vrot.slane %v978_v25, 2  ;;  %v980_v27 = vpop.f32.mrb[17].mxu0 }
 0xe83   :  { %v982_v28 = vpop.f32.mrb[18].mxu0  ;;  %v988_v32 = vrot.slane %v980_v27, 2 }
 0xe84   :  { %v991_v29 = vadd.f32 %v987_v23, %v1775_v33  ;;  %v983_v30 = vpop.f32.mrb[19].mxu0 }
 0xe85   :  { %v992_v35 = vadd.f32 %v988_v32, %v1777_v36  ;;  %v1238_v32 = vld [vmem:[%s2017_s2] sm:$0xff] }
 0xe86   :  { %v1385_v31 = vmul.f32 -1.442695, %v991_v29 }
 0xe87   :  { %v1386_v33 = vmul.f32 -1.442695, %v992_v35 }
 0xe88   :  { %1554 = vpow2.f32 %v1385_v31  ;;  %v1239_v31 = vld [vmem:[%s2017_s2 + $0x8] sm:$0xff] }
 0xe89   :  { %1556 = vtanh.f32 %v992_v35 }
 0xe92   :  { %v1555_v37 = vpop.eup %1554 }
 0xe93   :  { %v999_v39 = vadd.f32 1.0, %v1555_v37  ;;  %v1557_v40 = vpop.eup %1556 }
 0xe95   :  { %1558 = vrcp.f32 %v999_v39  ;;  %v1237_v39 = vand.u32 127, %v51_v18  ;;  %v1277_v18 = vsel %vm1262_vm10, %v1881_v51, 0.0 }
 0xe96   :  { %1560 = vpow2.f32 %v1386_v33 }
 0xe9f   :  { %v1559_v41 = vpop.eup %1558 }
 0xea0   :  { %v1012_v42 = vmul.f32 %v1559_v41, %v1557_v40  ;;  %v1561_v36 = vpop.eup %1560  ;;  %v1011_v44 = vmul.f32 %v1559_v41, %v1009_v17 }
 0xea1   :  { %v1000_v43 = vadd.f32 1.0, %v1561_v36 }
 0xea2   :  { %1014 = vrot.lane.b32.xlu0 %v1012_v42, %s1602_s4 }
 0xea3   :  { %1562 = vrcp.f32 %v1000_v43 }
 0xea6   :  { %503 = vrot.lane.b32.xlu0 %v1831_v21, %s1602_s4  ;;  %v1465_v21 = vld [vmem:[%s2022_s7] sm:$0xff]   ;;  %s1605_s7 = smov 96  }
 0xeaa   :  { %713 = vrot.lane.b32.xlu0 %v1874_v48, %s1602_s4  ;;  %v1603_v48 = vmov 0.0  }
 0xeab   :  { %1420 = vmatprep.subr.bf16.mxu0 %v1603_v48  ;;  %1424 = vmatprep.mubr.msk.bf16.mxu0 %vm1604_vm5, %v1603_v48 }
 0xeac   :  { %1421 = vmatpush3.bf16.msra.mxu0 %v1465_v21  ;;  %1406 = vmatprep.subr.bf16.mxu1 %v1603_v48 }
 0xead   :  { %1422 = vmatprep.subr.bf16.mxu0 %v1603_v48  ;;  %1408 = vmatprep.mubr.msk.bf16.mxu1 %vm1604_vm5, %v1603_v48  ;;  %v1563_v1 = vpop.eup %1562 }
 0xeae   :  { %935 = vrot.lane.b32.xlu0 %v908_v6, %s1602_s4 }
 0xeb0   :  { %1423 = vmatpush3.bf16.msra.mxu0 %v1466_v50 }
 0xf14   :  { %v1015_v45 = vpop.permute.xlu0 %1014 }
 0xf15   :  { %v1017_v46 = vadd.f32 %v1015_v45, %v1011_v44 }
 0xf17   :  { %1564 = vtanh.f32 %v1017_v46 }
 0xf18   :  { %v504_v47 = vpop.permute.xlu0 %503 }
 0xf19   :  { %v506_v49 = vmul.f32 %v504_v47, %v1788_v54  ;;  %v1276_v47 = vsel %vm1262_vm10, %v1788_v54, 0.0  ;;  %v1576_v54 = vld [vmem:[%s2016_s1] sm:$0xff] }
 0xf1b   :  { %508 = vst.msk [vmem:[#allocation2] sm:$0x30] %vm507_vm4, %v506_v49 }
 0xf1c   :  { %v714_v52 = vpop.permute.xlu0 %713 }
 0xf1d   :  { %v716_v53 = vmul.f32 %v714_v52, %v1881_v51 }
 0xf1f   :  { %717 = vst.msk [vmem:[#allocation2 + $0x8] sm:$0x3] %vm283_vm1, %v716_v53  ;;  %v1278_v53 = vadd.f32 %v1277_v18, %v1276_v47 }
 0xf20   :  { %v936_v55 = vpop.permute.xlu0 %935 }
 0xf21   :  { %v1565_v56 = vpop.eup %1564  ;;  %v938_v26 = vmul.f32 %v936_v55, %v1881_v51 }
 0xf22   :  { %v1019_v57 = vmul.f32 %v1565_v56, %v1563_v1  ;;  %v1026_v38 = vld [vmem:[#allocation2] sm:$0xff] }
 0xf23   :  { %939 = vst.msk [vmem:[#allocation2 + $0x8] sm:$0x30] %vm507_vm4, %v938_v26 }
 0xf24   :  { %1021 = vrot.lane.b32.xlu1 %v1019_v57, %s1602_s4  ;;  %s1334_s4 = sshll.u32 %s1606_s3, 4  ;;  %s1335_s4 = int_to_ptr.vmem [resolvable:$true] %s1334_s4 }
 0xf25   :  { %s1577_s5 = scalar_lea.vmem %s1335_s4, 16  ;;  %s1581_s13 = scalar_lea.vmem %s1335_s4, 32 }
 0xf26   :  { %p1578_p0 = scmp.ne.s32.totalorder %s1335_s4, %s1577_s5  ;;  %p1582_p1 = scmp.lt.s32.totalorder %s1335_s4, %s1335_s4 }
 0xf27   :  { %p1583_p2 = scmp.lt.s32.totalorder %s1581_s13, %s1577_s5 }
 0xf29   :  { %p1584_p3 = por %p1583_p2, %p1582_p1 }
 0xf2b   :  { %p1585_p4 = pnand %p1584_p3, %p1578_p0 }
 0xf96   :  { %v1022_v58 = vpop.permute.xlu1 %1021 }
 0xf97   :  { %v1024_v59 = vmul.f32 %v1022_v58, %v1881_v51 }
 0xf99   :  { %1025 = vst.msk [vmem:[#allocation2 + $0x8] sm:$0xc0] %vm619_vm3, %v1024_v59 }
 0xfa0   :  { %v1027_v60 = vld [vmem:[#allocation2 + $0x8] sm:$0xff] }
 0xfa1   :  { %v1028_v61 = vpack.c.bf16 %v1027_v60, %v1026_v38 }
 0xfa3   :  { %1037 = vrot.lane.b32.xlu0 %v1028_v61, %s1605_s7  ;;  %1425 = vmatmul.mubr.msk.bf16.vlgmr.msra.gmra.mrb[20].mxu0 %vm1106_vm6, %v1028_v61 }
0x1015   :  { %v1038_v63 = vpop.permute.xlu0 %1037 }
0x1016   :  { %1407 = vmatpush3.bf16.msra.mxu1 %v1038_v63 }
0x1017   :  { %1412 = vmatprep.subr.bf16.mxu1 %v1603_v48 }
0x1019   :  { %1409 = vmatmul.mubr.msk.bf16.vlgmr.msra.gmra.mrb[16].mxu1 %vm1040_vm7, %v1467_v4 }
0x101a   :  { %1413 = vmatpush3.bf16.msra.mxu1 %v1468_v0  ;;  %1416 = vmatprep.mubr.msk.bf16.mxu1 %vm1604_vm5, %v1603_v48 }
0x101b   :  { %1414 = vmatprep.subr.bf16.mxu1 %v1603_v48 }
0x101e   :  { %1415 = vmatpush3.bf16.msra.mxu1 %v1469_v2 }
0x1076   :  { %v1200_v6 = vpop.f32.mrb[20].mxu0 }
0x1077   :  { %v1426_v8 = vpop.f32.mrb[21].mxu0 }
0x1078   :  { %v1203_v3 = vpop.f32.mrb[22].mxu0 }
0x1079   :  { %v1427_v10 = vpop.f32.mrb[23].mxu0 }
0x10ec   :  { %v1078_v12 = vpop.f32.mrb[16].mxu1 }
0x10ed   :  { %v1410_v14 = vpop.f32.mrb[17].mxu1 }
0x10ee   :  { %v1081_v5 = vpop.f32.mrb[18].mxu1 }
0x10ef   :  { %v1085_v16 = vpack.c.bf16 %v1081_v5, %v1078_v12  ;;  %v1411_v7 = vpop.f32.mrb[19].mxu1 }
0x10f1   :  { %1417 = vmatmul.mubr.msk.bf16.vlgmr.msra.gmra.mrb[20].mxu1 %vm1106_vm6, %v1085_v16 }
0x11c4   :  { %v1144_v9 = vpop.f32.mrb[20].mxu1 }
0x11c5   :  { %v1201_v13 = vadd.f32 %v1200_v6, %v1144_v9  ;;  %v1418_v15 = vpop.f32.mrb[21].mxu1 }
0x11c6   :  { %v1147_v17 = vpop.f32.mrb[22].mxu1 }
0x11c7   :  { %v1214_v19 = vadd.f32 %v1395_v11, %v1201_v13  ;;  %v1204_v20 = vadd.f32 %v1203_v3, %v1147_v17  ;;  %v1419_v34 = vpop.f32.mrb[23].mxu1 }
0x11c9   :  { %v1215_v22 = vadd.f32 %v1395_v11, %v1204_v20  ;;  %1216 = vmax.xlane.f32.xlu1 %v1214_v19 }
0x11cb   :  { %1218 = vmax.xlane.f32.xlu0 %v1215_v22 }
0x1256   :  { %v1217_v62 = vpop.xlane.xlu1 %1216 }
0x1257   :  { %v1220_v24 = vsub.f32 %v1214_v19, %v1217_v62  ;;  %vm1294_vm11 = vcmp.ge.f32.partialorder %v1214_v19, %v1217_v62 }
0x1258   :  { %v1219_v25 = vpop.xlane.xlu0 %1218  ;;  %v1296_v50 = vsel %vm1294_vm11, %v1237_v39, 128 }
0x1259   :  { %v1222_v23 = vmul.f32 1.442695, %v1220_v24  ;;  %v1221_v27 = vsub.f32 %v1215_v22, %v1219_v25  ;;  %v1299_v1 = vshra.s32 %v1296_v50, 16  ;;  %vm1295_vm12 = vcmp.ge.f32.partialorder %v1215_v22, %v1219_v25 }
0x125a   :  { %v1297_v59 = vsel %vm1295_vm12, %v1237_v39, 128  ;;  %v1298_v6 = vand.u32 65535, %v1296_v50 }
0x125b   :  { %1566 = vpow2.f32 %v1222_v23  ;;  %v1224_v28 = vmul.f32 1.442695, %v1221_v27  ;;  %v1301_v55 = vcvt.s32.f32 %v1299_v1  ;;  %v1313_v0 = vshra.s32 %v1297_v59, 16 }
0x125c   :  { %v1300_v3 = vcvt.s32.f32 %v1298_v6  ;;  %v1312_v16 = vand.u32 65535, %v1297_v59 }
0x125d   :  { %1568 = vpow2.f32 %v1224_v28  ;;  %v1315_v8 = vcvt.s32.f32 %v1313_v0 }
0x125e   :  { %v1314_v13 = vcvt.s32.f32 %v1312_v16 }
0x1265   :  { %v1567_v29 = vpop.eup %1566 }
0x1266   :  { %1226 = vadd.xlane.f32.xlu0 %v1567_v29 }
0x1267   :  { %v1569_v30 = vpop.eup %1568 }
0x1268   :  { %1228 = vadd.xlane.f32.xlu1 %v1569_v30 }
0x1279   :  { %1244 = vperm.xlu1 %1439, %v1239_v31  }
0x127c   :  { %1241 = vperm.xlu0 %1438, %v1238_v32  }
0x12f3   :  { %v1227_v35 = vpop.xlane.xlu0 %1226 }
0x12f4   :  { %1570 = vlog2.f32 %v1227_v35 }
0x12f5   :  { %v1229_v37 = vpop.xlane.xlu1 %1228 }
0x12f6   :  { %1572 = vlog2.f32 %v1229_v37 }
0x12f9   :  { %v1245_v41 = vpop.permute.xlu1 %1244 }
0x12fa   :  { %vm1247_vm9 = vcmp.eq.s32.totalorder %v1237_v39, %v1245_v41 }
0x12fb   :  { %v1242_v40 = vpop.permute.xlu0 %1241  ;;  %v1397_v46 = vsel %vm1247_vm9, 1.0, %v1603_v48 }
0x12fc   :  { %vm1246_vm8 = vcmp.eq.s32.totalorder %v1237_v39, %v1242_v40 }
0x12fd   :  { %v1396_v43 = vsel %vm1246_vm8, 1.0, %v1603_v48 }
0x12fe   :  { %v1571_v42 = vpop.eup %1570 }
0x12ff   :  { %v1231_v33 = vmul.f32 0.6931472, %v1571_v42 }
0x1300   :  { %v1573_v36 = vpop.eup %1572 }
0x1301   :  { %v1233_v44 = vmul.f32 0.6931472, %v1573_v36  ;;  %v1234_v45 = vsub.f32 %v1220_v24, %v1231_v33 }
0x1303   :  { %v1252_v49 = vmul.f32 %v1396_v43, %v1234_v45  ;;  %v1235_v21 = vsub.f32 %v1221_v27, %v1233_v44 }
0x1305   :  { %1254 = vadd.xlane.f32.xlu1 %v1252_v49  ;;  %v1253_v52 = vmul.f32 %v1397_v46, %v1235_v21 }
0x1307   :  { %1256 = vadd.xlane.f32.xlu0 %v1253_v52 }
0x1309   :  { %1279 = vadd.xlane.f32.xlu1 %v1278_v53 }
0x130d   :  { %1302 = vmin.xlane.f32.xlu1 %v1301_v55 }
0x1392   :  { %v1255_v56 = vpop.xlane.xlu1 %1254 }
0x1393   :  { %v1258_v26 = vsub.f32 0.0, %v1255_v56 }
0x1394   :  { %v1257_v48 = vpop.xlane.xlu0 %1256 }
0x1395   :  { %v1260_v57 = vmul.f32 %v1576_v54, %v1258_v26  ;;  %v1259_v58 = vsub.f32 0.0, %v1257_v48 }
0x1396   :  { %v1280_v60 = vpop.xlane.xlu1 %1279 }
0x1397   :  { %v1261_v38 = vmul.f32 %v1259_v58, %v1881_v51  ;;  %v1263_v61 = vsel %vm1262_vm10, %v1260_v57, 0.0  ;;  %v1281_v12 = vrot.slane %v1280_v60, 4 }
0x1399   :  { %v1264_v63 = vsel %vm1262_vm10, %v1261_v38, 0.0  ;;  %v1282_v14 = vadd.f32 %v1281_v12, %v1280_v60 }
0x139a   :  { %v1265_v4 = vadd.f32 %v1264_v63, %v1263_v61  ;;  %v1303_v2 = vpop.xlane.xlu1 %1302 }
0x139b   :  { %vm1304_vm13 = vcmp.eq.f32.partialorder %v1301_v55, %v1303_v2  ;;  %v1283_v5 = vrot.slane %v1282_v14, 2  ;;  %v1309_v17 = vcvt.f32.s32 %v1303_v2 }
0x139c   :  { %1266 = vadd.xlane.f32.xlu1 %v1265_v4  ;;  %v1305_v10 = vsel %vm1304_vm13, %v1300_v3, inf }
0x139d   :  { %v1284_v15 = vadd.f32 %v1283_v5, %v1282_v14  ;;  %v1310_v24 = vshll.u32 %v1309_v17, 16 }
0x139f   :  { %v1285_v62 = vrot.slane %v1284_v15, 1 }
0x13a0   :  { %1316 = vmin.xlane.f32.xlu1 %v1315_v8 }
0x13a1   :  { %v1286_v29 = vadd.f32 %v1285_v62, %v1284_v15 }
0x13a4   :  { %1306 = vmin.xlane.f32.xlu1 %v1305_v10 }
0x1429   :  { %v1267_v51 = vpop.xlane.xlu1 %1266 }
0x142a   :  { %v1268_v7 = vrot.slane %v1267_v51, 4 }
0x142c   :  { %v1269_v9 = vadd.f32 %v1268_v7, %v1267_v51 }
0x142d   :  { %v1317_v11 = vpop.xlane.xlu1 %1316 }
0x142e   :  { %v1270_v19 = vrot.slane %v1269_v9, 2  ;;  %vm1318_vm14 = vcmp.eq.f32.partialorder %v1315_v8, %v1317_v11 }
0x142f   :  { %v1319_v20 = vsel %vm1318_vm14, %v1314_v13, inf }
0x1430   :  { %1320 = vmin.xlane.f32.xlu1 %v1319_v20  ;;  %v1271_v34 = vadd.f32 %v1270_v19, %v1269_v9 }
0x1431   :  { %v1307_v22 = vpop.xlane.xlu1 %1306 }
0x1432   :  { %v1308_v25 = vcvt.f32.s32 %v1307_v22  ;;  %v1272_v23 = vrot.slane %v1271_v34, 1 }
0x1434   :  { %v1311_v27 = vadd.s32 %v1310_v24, %v1308_v25  ;;  %v1273_v28 = vadd.f32 %v1272_v23, %v1271_v34 }
0x1436   :  { %1326 = vst.msk [vmem:[%s2026_s11] sm:$0xff] %vm1262_vm10, %v1311_v27 }
0x1437   :  { %1428 = vpush %v1273_v28 }
0x1438   :  { %1430 = vpush %v1286_v29 }
0x1468   :  { %s1429_s12 = spop %1428 }
0x1469   :  { %s1431_s0 = spop %1430  ;;  %v1275_v35 = vstv %s1429_s12 }
0x146a   :  { %v1288_v30 = vstv %s1431_s0 }
0x146b   :  { %v1289_v31 = vmax.f32 %v1288_v30, 1.0 }
0x146d   :  { %1574 = vrcp.f32 %v1289_v31 }
0x1477   :  { %v1575_v32 = vpop.eup %1574 }
0x1478   :  { %v1291_v37 = vmul.f32 %v1575_v32, %v1275_v35 }
0x147a   :  { %1293 = vst.msk [vmem:[#allocation3] sm:$0x1] %vm1292_vm15, %v1291_v37 }
0x147b   :  { %1588 = shalt.err (!%p1585_p4)
}
0x147c   :  { %s1589_s16 = scalar_lea.hbm %s2025_s10, 16 }
0x147d   :  { %p1590_p5 = scmp.ne.s32.totalorder %s2025_s10, %s1589_s16  ;;  %p1593_p6 = scmp.lt.u32.totalorder %s1589_s16, %s2025_s10 }
0x147f   :  { %p1595_p7 = pnand %p1593_p6, %p1590_p5 }
0x1481   :  { %1598 = shalt.err (!%p1595_p7)
}
0x1482   :  { %1337 = dma.vmem_to_hbm [thread:$0]  %s1335_s4, 16, %s2025_s10, [#allocation4]   ;;  %v1323_v39 = vcvt.f32.s32 %v1317_v11 }
0x1484   :  { %v1324_v41 = vshll.u32 %v1323_v39, 16 }
0x14bd   :  { %v1321_v40 = vpop.xlane.xlu1 %1320 }
0x14be   :  { %v1322_v42 = vcvt.f32.s32 %v1321_v40 }
0x14c0   :  { %v1325_v33 = vadd.s32 %v1324_v41, %v1322_v42 }
0x14c2   :  { %1327 = vst.msk [vmem:[%s2026_s11 + $0x8] sm:$0xff] %vm1262_vm10, %v1325_v33 }
0x14c3   :  { %1599 = dma.done.wait [#allocation4], 16  }
0x14c4   :  { %1600 = vsyncadd [#allocation4], 4294967280 }
0x14c5   :  { %1345 = vsyncpa [#allocation4], 1 }

</bundles_post_ra>
